<compile_context>
chip_gen: v7x
topology: tpu7x:2x2x1
jax: 0.10.0
libtpu: 0.0.40
codegen_flags: <defaults>
</compile_context>

<pallas_src>
import functools

import numpy as np
import jax
import jax.numpy as jnp
from jax import lax
from jax.experimental import pallas as pl
from jax.experimental.pallas import tpu as pltpu

_BN_EPS = 1e-5


def _device_config():
    """Per-TPU-generation defaults: output-channel tile width and VMEM limit."""
    try:
        kind = jax.devices()[0].device_kind.lower()
    except Exception:
        kind = ""
    if "v7" in kind:    # 64 MiB VMEM per TC, 2x256 MXU
        return {"tco_max": 256, "vmem_limit": 48 << 20}
    if "v6" in kind:    # 128 MiB VMEM, 2x256 MXU
        return {"tco_max": 256, "vmem_limit": 80 << 20}
    if "v5" in kind:    # 128 MiB VMEM, 128-wide MXU (N=256 buys nothing)
        return {"tco_max": 128, "vmem_limit": 80 << 20}
    return {"tco_max": 256, "vmem_limit": 48 << 20}   # unknown: conservative


# ----------------------------------------------------------------------------
# Fused [optional 2x2 maxpool] -> 3x3 conv (pad=1) -> BN(scale/bias) -> ReLU
# ----------------------------------------------------------------------------
def _conv_kernel(*refs, tr, wd, cin, tco, pooled, has_halo, full_im2col):
    # refs (has_halo):  xm, xt, xb, w, s, b, o, pad_scratch
    # refs (no halo):   xm,         w, s, b, o, pad_scratch
    # xm: pooled (1,tr,2,wd,2,cin) else (1,tr,wd,cin); xt/xb: 1-row halo blocks
    # w: (9*cin, tco)   s/b: (1, tco) f32   o: (1, tr*wd, tco)
    # pad_scratch: (tr+2, wd+2, cin)
    if has_halo:
        xm_ref, xt_ref, xb_ref, w_ref, s_ref, b_ref, o_ref, pad_ref = refs
    else:
        xm_ref, w_ref, s_ref, b_ref, o_ref, pad_ref = refs
        xt_ref = xb_ref = None

    def pool2x2(v):
        # (rows, 2, wd, 2, cin) -> (rows, wd, cin); cheap VPU maxes.
        return jnp.max(jnp.max(v, axis=3), axis=1)

    main = pool2x2(xm_ref[0]) if pooled else xm_ref[0]

    # Assemble the zero-padded (tr+2, wd+2, cin) tile in VMEM.  Boundary halo
    # rows / the side columns are zeros (== the conv's zero padding).  No
    # padded copy is ever made in HBM.
    zrow = jnp.zeros((1, wd, cin), pad_ref.dtype)
    zcol = jnp.zeros((tr + 2, 1, cin), pad_ref.dtype)
    pad_ref[pl.ds(1, tr), pl.ds(1, wd), :] = main
    pad_ref[:, pl.ds(0, 1), :] = zcol
    pad_ref[:, pl.ds(wd + 1, 1), :] = zcol
    # TODO(synk): check the Mosaic bundle dump for relayout copies from these
    # unaligned sublane slices / 1-wide column stores (perf-review item 12).

    if has_halo:
        r = pl.program_id(2)
        nrb = pl.num_programs(2)
        top = pool2x2(xt_ref[0]) if pooled else xt_ref[0]
        bot = pool2x2(xb_ref[0]) if pooled else xb_ref[0]
        pad_ref[pl.ds(0, 1), pl.ds(1, wd), :] = top
        pad_ref[pl.ds(tr + 1, 1), pl.ds(1, wd), :] = bot

        @pl.when(r == 0)
        def _():
            pad_ref[pl.ds(0, 1), pl.ds(1, wd), :] = zrow

        @pl.when(r == nrb - 1)
        def _():
            pad_ref[pl.ds(tr + 1, 1), pl.ds(1, wd), :] = zrow
    else:
        # Whole-image row tile: no halo operands at all (two fewer DMAs/step).
        pad_ref[pl.ds(0, 1), pl.ds(1, wd), :] = zrow
        pad_ref[pl.ds(tr + 1, 1), pl.ds(1, wd), :] = zrow

    def tap(dy, dx):
        return pad_ref[pl.ds(dy, tr), pl.ds(dx, wd), :].reshape(tr * wd, cin)

    if full_im2col:
        # Tiny cin (first conv): full K=9*cin im2col, a single MXU matmul.
        patch = jnp.concatenate([tap(dy, dx) for dy in range(3)
                                 for dx in range(3)], axis=-1)
        acc = jnp.dot(patch, w_ref[...], preferred_element_type=jnp.float32)
    else:
        # 9 direct K=cin matmuls against the padded tile.  No concat
        # temporaries; accumulator is seeded by the first dot (no zeros RMW).
        acc = None
        for dy in range(3):
            for dx in range(3):
                d = jnp.dot(tap(dy, dx),
                            w_ref[pl.ds((3 * dy + dx) * cin, cin), :],
                            preferred_element_type=jnp.float32)
                acc = d if acc is None else acc + d

    # Fused BN (inference form, folded scale/bias) + ReLU epilogue.
    y = jnp.maximum(acc * s_ref[...] + b_ref[...], 0.0)
    o_ref[0] = y.astype(o_ref.dtype)


def _pick_row_tile(h, wd, per_row_bytes, fixed_bytes, budget,
                   acc_row_bytes, acc_budget, max_rows):
    """Largest divisor of h whose per-step footprint fits the VMEM budget,
    whose flattened output block (t*wd) is 8-sublane aligned (or t == h), and
    (preferably) whose f32 accumulator stays under acc_budget."""
    cands = [t for t in range(1, h + 1)
             if h % t == 0 and ((t * wd) % 8 == 0 or t == h) and t <= max_rows]
    if not cands:
        return h
    for ok in (
        lambda t: (fixed_bytes + t * per_row_bytes <= budget
                   and t * acc_row_bytes <= acc_budget),
        lambda t: fixed_bytes + t * per_row_bytes <= budget,
    ):
        fit = [t for t in cands if ok(t)]
        if fit:
            return max(fit)
    # Nothing fits the budget: degrade gracefully to the smallest legal tile.
    return min(cands)


def conv3x3_bn_relu(x, w, scale, bias, *, pool=False,
                    compute_dtype=jnp.bfloat16, tco_max=None,
                    max_row_tile=None):
    """relu(scale * conv3x3(maxpool2x2(x) if pool else x, w) + bias).

    x: (N, Hin, Win, Cin) NHWC.  w: (3, 3, Cin, Cout).  scale/bias: (Cout,)
    (conv bias + inference BatchNorm folded by the caller).
    """
    n, hin, win, cin = x.shape
    cout = w.shape[-1]
    x = x.astype(compute_dtype)

    cfg = _device_config()
    tco_max = tco_max or cfg["tco_max"]
    vmem_limit = cfg["vmem_limit"]

    if pool:
        assert hin % 2 == 0 and win % 2 == 0
        h, wd = hin // 2, win // 2
        # Row-major-compatible (free) reshape: the 2x2 pool windows become the
        # size-2 axes that the kernel max-reduces before the conv.
        x_in = x.reshape(n, h, 2, wd, 2, cin)
    else:
        h, wd = hin, win
        x_in = x

    # Output-channel tile: 256 for the 256-wide MXU (v6e/v7x), 128 on v5e.
    # TODO(synk): cout=64 (stage 1) leaves the output lane dim half-dense;
    # measure masked-vst cost before investing in lane packing.
    tco = min(cout, tco_max)
    assert cout % tco == 0
    ncj = cout // tco

    # Full per-step VMEM footprint: weight block x2 (double buffer), halo rows
    # x2, and per-row terms (main input x2, pad scratch, im2col/pool temps,
    # f32 accumulator, output x2).  Budget = 70% of the explicit vmem limit.
    isz = jnp.dtype(compute_dtype).itemsize
    pf = 4 if pool else 1
    fixed = (9 * cin * tco * isz * 2          # weight block, double-buffered
             + 2 * pf * wd * cin * isz * 2    # halo blocks, double-buffered
             + 4 * tco * 4)                   # scale / bias
    per_row = (pf * wd * cin * isz * 2        # main input block x2 buffers
               + (wd + 2) * cin * isz         # pad scratch
               + 2 * wd * cin * isz           # pool / im2col temporaries
               + wd * tco * 4                 # f32 accumulator
               + wd * tco * isz * 2)          # output block x2 buffers
    tr = _pick_row_tile(h, wd, per_row, fixed, int(vmem_limit * 0.7),
                        wd * tco * 4, 2 << 20,
                        max_row_tile if max_row_tile else 512)
    nrb = h // tr
    has_halo = nrb > 1
    full_im2col = cin < 64                    # first conv (cin = num_channels)

    w2 = w.reshape(9 * cin, cout).astype(compute_dtype)
    s2 = scale.reshape(1, cout).astype(jnp.float32)
    b2 = bias.reshape(1, cout).astype(jnp.float32)

    if pool:
        main_spec = pl.BlockSpec((1, tr, 2, wd, 2, cin),
                                 lambda j, b, r: (b, r, 0, 0, 0, 0))
        top_spec = pl.BlockSpec(
            (1, 1, 2, wd, 2, cin),
            lambda j, b, r: (b, jnp.maximum(r * tr - 1, 0), 0, 0, 0, 0))
        bot_spec = pl.BlockSpec(
            (1, 1, 2, wd, 2, cin),
            lambda j, b, r: (b, jnp.minimum((r + 1) * tr, h - 1), 0, 0, 0, 0))
    else:
        main_spec = pl.BlockSpec((1, tr, wd, cin),
                                 lambda j, b, r: (b, r, 0, 0))
        top_spec = pl.BlockSpec(
            (1, 1, wd, cin),
            lambda j, b, r: (b, jnp.maximum(r * tr - 1, 0), 0, 0))
        bot_spec = pl.BlockSpec(
            (1, 1, wd, cin),
            lambda j, b, r: (b, jnp.minimum((r + 1) * tr, h - 1), 0, 0))

    in_specs = [main_spec]
    inputs = [x_in]
    if has_halo:
        in_specs += [top_spec, bot_spec]
        inputs += [x_in, x_in]
    in_specs += [
        pl.BlockSpec((9 * cin, tco), lambda j, b, r: (0, j)),
        pl.BlockSpec((1, tco), lambda j, b, r: (0, j)),
        pl.BlockSpec((1, tco), lambda j, b, r: (0, j)),
    ]
    inputs += [w2, s2, b2]

    kernel = functools.partial(_conv_kernel, tr=tr, wd=wd, cin=cin, tco=tco,
                               pooled=pool, has_halo=has_halo,
                               full_im2col=full_im2col)

    out = pl.pallas_call(
        kernel,
        out_shape=jax.ShapeDtypeStruct((n, h * wd, cout), compute_dtype),
        grid_spec=pltpu.PrefetchScalarGridSpec(
            num_scalar_prefetch=0,
            # cout-tile axis OUTERMOST: the multi-MiB weight block is now the
            # slowest-changing DMA (fetched ncj times total, not n*ncj); the
            # input row stream is the pipelined, fastest-changing one.  Input
            # prep is redone ncj times per row tile, but ncj>1 only at the
            # deep stages where the activation tile is tiny.
            grid=(ncj, n, nrb),
            in_specs=in_specs,
            out_specs=pl.BlockSpec((1, tr * wd, tco),
                                   lambda j, b, r: (b, r, j)),
            scratch_shapes=[pltpu.VMEM((tr + 2, wd + 2, cin), compute_dtype)],
        ),
        compiler_params=pltpu.CompilerParams(
            dimension_semantics=("parallel", "parallel", "parallel"),
            vmem_limit_bytes=vmem_limit),
    )(*inputs)
    return out.reshape(n, h, wd, cout)


# ----------------------------------------------------------------------------
# Parameter init (deterministic, shapes from the PyTorch module __init__)
# ----------------------------------------------------------------------------
def init_params(key, num_channels):
    chans = [num_channels, 64, 128, 256, 512, 1024]
    params = []
    for i in range(5):
        cin, cout = chans[i], chans[i + 1]
        layer = {}
        for name, ci, co in (("conv1", cin, cout), ("conv2", cout, cout)):
            key, k1, k2, k3, k4 = jax.random.split(key, 5)
            fan_in = ci * 9
            w = jax.random.normal(k1, (3, 3, ci, co), jnp.float32) * (2.0 / fan_in) ** 0.5
            b = jax.random.uniform(k2, (co,), jnp.float32, -0.05, 0.05)
            gamma = 1.0 + 0.1 * jax.random.normal(k3, (co,), jnp.float32)
            beta = 0.1 * jax.random.normal(k4, (co,), jnp.float32)
            run_mean = jnp.zeros((co,), jnp.float32)
            run_var = jnp.ones((co,), jnp.float32)
            # fold conv bias + inference BN into per-channel scale / bias
            scale = gamma / jnp.sqrt(run_var + _BN_EPS)
            bias = beta + (b - run_mean) * scale
            layer[name] = (w, scale, bias)
        params.append(layer)
    return params


# ----------------------------------------------------------------------------
# Forward pass (matches UnetEncoder.forward semantics)
# ----------------------------------------------------------------------------
def unet_encoder_forward(x_nchw, params, *, compute_dtype=jnp.bfloat16,
                         max_row_tile=None):
    x = jnp.transpose(x_nchw, (0, 2, 3, 1))              # NCHW -> NHWC
    for i, layer in enumerate(params):
        # TODO(synk): for the deep stages (tiny H,W) conv1+conv2 could be fused
        # into a single kernel keeping the intermediate in VMEM, removing one
        # HBM round trip and one kernel launch per stage.
        w, s, b = layer["conv1"]
        x = conv3x3_bn_relu(x, w, s, b, pool=(i > 0),     # module1 has no pool
                            compute_dtype=compute_dtype,
                            max_row_tile=max_row_tile)
        w, s, b = layer["conv2"]
        x = conv3x3_bn_relu(x, w, s, b, pool=False,
                            compute_dtype=compute_dtype,
                            max_row_tile=max_row_tile)
    return jnp.transpose(x, (0, 3, 1, 2)).astype(jnp.float32)   # NHWC -> NCHW


# Pure-JAX reference (mirrors the kernel's dtype handling for verification).
def _ref_forward(x_nchw, params, compute_dtype=jnp.float32):
    dn = ("NHWC", "HWIO", "NHWC")
    x = jnp.transpose(x_nchw, (0, 2, 3, 1)).astype(compute_dtype)
    for i, layer in enumerate(params):
        if i > 0:
            n, h, w, c = x.shape
            x = x.reshape(n, h // 2, 2, w // 2, 2, c).max(axis=(2, 4))
        for name in ("conv1", "conv2"):
            wgt, s, b = layer[name]
            y = lax.conv_general_dilated(x, wgt.astype(compute_dtype), (1, 1),
                                         "SAME", dimension_numbers=dn,
                                         preferred_element_type=jnp.float32)
            x = jnp.maximum(y * s + b, 0.0).astype(compute_dtype)
    return jnp.transpose(x, (0, 3, 1, 2)).astype(jnp.float32)


if __name__ == "__main__":
    key = jax.random.PRNGKey(0)
    kx, kx2, kp = jax.random.split(key, 3)
    num_channels = 4
    params = init_params(kp, num_channels)

    # --- small input, whole-image row tiles: strict f32 check vs XLA ---
    x = jax.random.normal(kx, (2, num_channels, 16, 16), jnp.float32)  # NCHW
    ref = _ref_forward(x, params, compute_dtype=jnp.float32)
    out = jax.block_until_ready(
        unet_encoder_forward(x, params, compute_dtype=jnp.float32))
    assert out.shape == (2, 1024, 1, 1), out.shape
    np.testing.assert_allclose(np.asarray(out), np.asarray(ref),
                               rtol=2e-3, atol=2e-3)

    # --- larger input, forced small row tiles: exercises the halo path with
    #     nrb>1 for both pooled and non-pooled convs and lane-aligned cin ---
    x2 = jax.random.normal(kx2, (1, num_channels, 32, 32), jnp.float32)
    ref2 = _ref_forward(x2, params, compute_dtype=jnp.float32)
    out2 = jax.block_until_ready(
        unet_encoder_forward(x2, params, compute_dtype=jnp.float32,
                             max_row_tile=4))
    assert out2.shape == (1, 1024, 2, 2), out2.shape
    np.testing.assert_allclose(np.asarray(out2), np.asarray(ref2),
                               rtol=5e-3, atol=5e-3)

    # --- bf16 MXU path (production config) vs a bf16 XLA reference ---
    out_bf = jax.block_until_ready(
        unet_encoder_forward(x, params, compute_dtype=jnp.bfloat16))
    ref_bf = _ref_forward(x, params, compute_dtype=jnp.bfloat16)
    np.testing.assert_allclose(np.asarray(out_bf), np.asarray(ref_bf),
                               rtol=1e-1, atol=1e-1)

    print("KERNEL_OK")
</pallas_src>

<mosaic_0001>
module attributes {stable_mosaic.version = 11 : i64} {
  func.func @_conv_kernel(%arg0: i32, %arg1: i32, %arg2: i32, %arg3: memref<1x16x16x4xf32, #tpu.memory_space<vmem>>, %arg4: memref<36x64xf32, #tpu.memory_space<vmem>>, %arg5: memref<1x64xf32, #tpu.memory_space<vmem>>, %arg6: memref<1x64xf32, #tpu.memory_space<vmem>>, %arg7: memref<1x256x64xf32, #tpu.memory_space<vmem>>, %arg8: memref<18x18x4xf32, #tpu.memory_space<vmem>>) attributes {dimension_semantics = [#tpu.dimension_semantics<parallel>, #tpu.dimension_semantics<parallel>, #tpu.dimension_semantics<parallel>], iteration_bounds = array<i64: 1, 2, 1>, scalar_prefetch = 0 : i64, scratch_operands = 1 : i64, tpu.core_type = #tpu.core_type<tc>, window_params = [{transform_indices = @transform_0, window_bounds = array<i64: 1, 16, 16, 4>}, {transform_indices = @transform_1, window_bounds = array<i64: 36, 64>}, {transform_indices = @transform_2, window_bounds = array<i64: 1, 64>}, {transform_indices = @transform_3, window_bounds = array<i64: 1, 64>}, {transform_indices = @transform_4, window_bounds = array<i64: 1, 256, 64>}]} {
    %c0 = arith.constant 0 : index
    %c0_0 = arith.constant 0 : index
    %c0_1 = arith.constant 0 : index
    %c0_2 = arith.constant 0 : index
    %0 = vector.load %arg3[%c0, %c0_0, %c0_1, %c0_2] : memref<1x16x16x4xf32, #tpu.memory_space<vmem>>, vector<1x16x16x4xf32>
    %1 = vector.shape_cast %0 : vector<1x16x16x4xf32> to vector<16x16x4xf32>
    %cst = arith.constant 0.000000e+00 : f32
    %2 = vector.broadcast %cst : f32 to vector<1x16x4xf32>
    %cst_3 = arith.constant 0.000000e+00 : f32
    %3 = vector.broadcast %cst_3 : f32 to vector<18x1x4xf32>
    %c1 = arith.constant 1 : index
    %c1_4 = arith.constant 1 : index
    %c0_5 = arith.constant 0 : index
    %4 = vector.load %arg8[%c1, %c1_4, %c0_5] : memref<18x18x4xf32, #tpu.memory_space<vmem>>, vector<16x16x4xf32>
    tpu.vector_store %arg8[%c1, %c1_4, %c0_5], %1 {strides = array<i32>} : memref<18x18x4xf32, #tpu.memory_space<vmem>>, vector<16x16x4xf32>,
    %c0_6 = arith.constant 0 : index
    %c0_7 = arith.constant 0 : index
    %c0_8 = arith.constant 0 : index
    %5 = vector.load %arg8[%c0_6, %c0_7, %c0_8] : memref<18x18x4xf32, #tpu.memory_space<vmem>>, vector<18x1x4xf32>
    tpu.vector_store %arg8[%c0_6, %c0_7, %c0_8], %3 {strides = array<i32>} : memref<18x18x4xf32, #tpu.memory_space<vmem>>, vector<18x1x4xf32>,
    %c0_9 = arith.constant 0 : index
    %c17 = arith.constant 17 : index
    %c0_10 = arith.constant 0 : index
    %6 = vector.load %arg8[%c0_9, %c17, %c0_10] : memref<18x18x4xf32, #tpu.memory_space<vmem>>, vector<18x1x4xf32>
    tpu.vector_store %arg8[%c0_9, %c17, %c0_10], %3 {strides = array<i32>} : memref<18x18x4xf32, #tpu.memory_space<vmem>>, vector<18x1x4xf32>,
    %c0_11 = arith.constant 0 : index
    %c1_12 = arith.constant 1 : index
    %c0_13 = arith.constant 0 : index
    %7 = vector.load %arg8[%c0_11, %c1_12, %c0_13] : memref<18x18x4xf32, #tpu.memory_space<vmem>>, vector<1x16x4xf32>
    tpu.vector_store %arg8[%c0_11, %c1_12, %c0_13], %2 {strides = array<i32>} : memref<18x18x4xf32, #tpu.memory_space<vmem>>, vector<1x16x4xf32>,
    %c17_14 = arith.constant 17 : index
    %c1_15 = arith.constant 1 : index
    %c0_16 = arith.constant 0 : index
    %8 = vector.load %arg8[%c17_14, %c1_15, %c0_16] : memref<18x18x4xf32, #tpu.memory_space<vmem>>, vector<1x16x4xf32>
    tpu.vector_store %arg8[%c17_14, %c1_15, %c0_16], %2 {strides = array<i32>} : memref<18x18x4xf32, #tpu.memory_space<vmem>>, vector<1x16x4xf32>,
    %c0_17 = arith.constant 0 : index
    %c0_18 = arith.constant 0 : index
    %c0_19 = arith.constant 0 : index
    %9 = vector.load %arg8[%c0_17, %c0_18, %c0_19] : memref<18x18x4xf32, #tpu.memory_space<vmem>>, vector<16x16x4xf32>
    %10 = vector.shape_cast %9 : vector<16x16x4xf32> to vector<256x4xf32>
    %c0_20 = arith.constant 0 : index
    %c1_21 = arith.constant 1 : index
    %c0_22 = arith.constant 0 : index
    %11 = vector.load %arg8[%c0_20, %c1_21, %c0_22] : memref<18x18x4xf32, #tpu.memory_space<vmem>>, vector<16x16x4xf32>
    %12 = vector.shape_cast %11 : vector<16x16x4xf32> to vector<256x4xf32>
    %c0_23 = arith.constant 0 : index
    %c2 = arith.constant 2 : index
    %c0_24 = arith.constant 0 : index
    %13 = vector.load %arg8[%c0_23, %c2, %c0_24] : memref<18x18x4xf32, #tpu.memory_space<vmem>>, vector<16x16x4xf32>
    %14 = vector.shape_cast %13 : vector<16x16x4xf32> to vector<256x4xf32>
    %c1_25 = arith.constant 1 : index
    %c0_26 = arith.constant 0 : index
    %c0_27 = arith.constant 0 : index
    %15 = vector.load %arg8[%c1_25, %c0_26, %c0_27] : memref<18x18x4xf32, #tpu.memory_space<vmem>>, vector<16x16x4xf32>
    %16 = vector.shape_cast %15 : vector<16x16x4xf32> to vector<256x4xf32>
    %c1_28 = arith.constant 1 : index
    %c1_29 = arith.constant 1 : index
    %c0_30 = arith.constant 0 : index
    %17 = vector.load %arg8[%c1_28, %c1_29, %c0_30] : memref<18x18x4xf32, #tpu.memory_space<vmem>>, vector<16x16x4xf32>
    %18 = vector.shape_cast %17 : vector<16x16x4xf32> to vector<256x4xf32>
    %c1_31 = arith.constant 1 : index
    %c2_32 = arith.constant 2 : index
    %c0_33 = arith.constant 0 : index
    %19 = vector.load %arg8[%c1_31, %c2_32, %c0_33] : memref<18x18x4xf32, #tpu.memory_space<vmem>>, vector<16x16x4xf32>
    %20 = vector.shape_cast %19 : vector<16x16x4xf32> to vector<256x4xf32>
    %c2_34 = arith.constant 2 : index
    %c0_35 = arith.constant 0 : index
    %c0_36 = arith.constant 0 : index
    %21 = vector.load %arg8[%c2_34, %c0_35, %c0_36] : memref<18x18x4xf32, #tpu.memory_space<vmem>>, vector<16x16x4xf32>
    %22 = vector.shape_cast %21 : vector<16x16x4xf32> to vector<256x4xf32>
    %c2_37 = arith.constant 2 : index
    %c1_38 = arith.constant 1 : index
    %c0_39 = arith.constant 0 : index
    %23 = vector.load %arg8[%c2_37, %c1_38, %c0_39] : memref<18x18x4xf32, #tpu.memory_space<vmem>>, vector<16x16x4xf32>
    %24 = vector.shape_cast %23 : vector<16x16x4xf32> to vector<256x4xf32>
    %c2_40 = arith.constant 2 : index
    %c2_41 = arith.constant 2 : index
    %c0_42 = arith.constant 0 : index
    %25 = vector.load %arg8[%c2_40, %c2_41, %c0_42] : memref<18x18x4xf32, #tpu.memory_space<vmem>>, vector<16x16x4xf32>
    %26 = vector.shape_cast %25 : vector<16x16x4xf32> to vector<256x4xf32>
    %27 = tpu.concatenate %10, %12, %14, %16, %18, %20, %22, %24, %26 in 1 : vector<256x4xf32>, vector<256x4xf32>, vector<256x4xf32>, vector<256x4xf32>, vector<256x4xf32>, vector<256x4xf32>, vector<256x4xf32>, vector<256x4xf32>, vector<256x4xf32> -> vector<256x36xf32>
    %c0_43 = arith.constant 0 : index
    %c0_44 = arith.constant 0 : index
    %28 = vector.load %arg4[%c0_43, %c0_44] : memref<36x64xf32, #tpu.memory_space<vmem>>, vector<36x64xf32>
    %cst_45 = arith.constant dense<0.000000e+00> : vector<256x64xf32>
    %29 = tpu.matmul %27, %28, %cst_45 {dimension_numbers = #tpu.dot_dimension_numbers<[1], [0], [0], [1], [0, 0, 1, 1], [], []>} : vector<256x36xf32>, vector<36x64xf32>, vector<256x64xf32> -> vector<256x64xf32>
    %c0_46 = arith.constant 0 : index
    %c0_47 = arith.constant 0 : index
    %30 = vector.load %arg5[%c0_46, %c0_47] : memref<1x64xf32, #tpu.memory_space<vmem>>, vector<1x64xf32>
    %31 = vector.broadcast %30 : vector<1x64xf32> to vector<256x64xf32>
    %32 = arith.mulf %29, %31 : vector<256x64xf32>
    %c0_48 = arith.constant 0 : index
    %c0_49 = arith.constant 0 : index
    %33 = vector.load %arg6[%c0_48, %c0_49] : memref<1x64xf32, #tpu.memory_space<vmem>>, vector<1x64xf32>
    %34 = vector.broadcast %33 : vector<1x64xf32> to vector<256x64xf32>
    %35 = arith.addf %32, %34 : vector<256x64xf32>
    %cst_50 = arith.constant 0.000000e+00 : f32
    %36 = vector.broadcast %cst_50 : f32 to vector<256x64xf32>
    %37 = arith.maximumf %35, %36 : vector<256x64xf32>
    %c0_51 = arith.constant 0 : index
    %c0_52 = arith.constant 0 : index
    %c0_53 = arith.constant 0 : index
    %38 = vector.load %arg7[%c0_51, %c0_52, %c0_53] : memref<1x256x64xf32, #tpu.memory_space<vmem>>, vector<1x256x64xf32>
    %39 = vector.shape_cast %38 : vector<1x256x64xf32> to vector<256x64xf32>
    %40 = vector.shape_cast %37 : vector<256x64xf32> to vector<1x256x64xf32>
    tpu.vector_store %arg7[%c0_51, %c0_52, %c0_53], %40 {strides = array<i32>} : memref<1x256x64xf32, #tpu.memory_space<vmem>>, vector<1x256x64xf32>,
    return
  }
  func.func @transform_0(%arg0: i32, %arg1: i32, %arg2: i32) -> (i32, i32, i32, i32) {
    %c0_i32 = arith.constant 0 : i32
    %c0_i32_0 = arith.constant 0 : i32
    %c0_i32_1 = arith.constant 0 : i32
    return %arg1, %arg2, %c0_i32, %c0_i32_0 : i32, i32, i32, i32
  }
  func.func @transform_1(%arg0: i32, %arg1: i32, %arg2: i32) -> (i32, i32) {
    %c0_i32 = arith.constant 0 : i32
    %c0_i32_0 = arith.constant 0 : i32
    return %c0_i32, %arg0 : i32, i32
  }
  func.func @transform_2(%arg0: i32, %arg1: i32, %arg2: i32) -> (i32, i32) {
    %c0_i32 = arith.constant 0 : i32
    %c0_i32_0 = arith.constant 0 : i32
    return %c0_i32, %arg0 : i32, i32
  }
  func.func @transform_3(%arg0: i32, %arg1: i32, %arg2: i32) -> (i32, i32) {
    %c0_i32 = arith.constant 0 : i32
    %c0_i32_0 = arith.constant 0 : i32
    return %c0_i32, %arg0 : i32, i32
  }
  func.func @transform_4(%arg0: i32, %arg1: i32, %arg2: i32) -> (i32, i32, i32) {
    %c0_i32 = arith.constant 0 : i32
    return %arg1, %arg2, %arg0 : i32, i32, i32
  }
}

</mosaic_0001>

<bundles_post_ra>
// kernel: tpu_custom_call.1
= control target key start
LH: loop header
LB: loop body
LE: loop exit
PB: predicated region body
PF: predicated region fallthrough
CT: control target
= control target key end

     0   :  { %s2870_s15 = smov 0   ;;  %s2872_s16 = smov 0   ;;  %s4404_s0 = inlined_call_operand.vmem [shape: f32[2,16,16,4], index: 0, kind: input, shape index: {}]   ;;  %s4405_s1 = inlined_call_operand.vmem [shape: f32[36,64], index: 1, kind: input, shape index: {}]   ;;  %s4406_s2 = inlined_call_operand.vmem [shape: f32[1,64], index: 2, kind: input, shape index: {}]   ;;  %s4407_s3 = inlined_call_operand.vmem [shape: f32[1,64], index: 3, kind: input, shape index: {}]   ;;  %s4408_s4 = inlined_call_operand.vmem [shape: f32[2,256,64], index: 4, kind: output, shape index: {}]  }
   0x1   :  { %s2874_s17 = smov 0  }
   0x2 LB: > { %s29_s18 = sadd.s32 1, %s2830_s16  ;;  %p2607_p0 = scmp.ge.s32.totalorder %s2834_s17, 1  ;;  %s2834_s17 = sphi %s2874_s17, %s14_s17   ;;  %s2830_s16 = sphi %s2872_s16, %s4556_s16   ;;  %s2826_s15 = sphi %s2870_s15, %s4555_s15  }
   0x3   : > { %p31_p1 = scmp.ge.s32.totalorder %s29_s18, 2  ;;  %p218_p2 = scmp.lt.s32.totalorder %s2834_s17, 3 }
   0x5   : > { %s4558_s18 = smov (%p31_p1, %s29_s18), 0  ;;  %p219_p3 = pnand %p2607_p0, %p218_p2 }
   0x7   : > { %222 = sbr.rel (%p219_p3) target bundleno = 887 (0x377), region = 36 }
   0xe   : > { %vm333_vm0 = vcmask 31744   ;;  %p267_p4 = scmp.lt.s32.totalorder %s2826_s15, 1  ;;  %vm366_vm1 = vcmask 24576   ;;  %v2836_v0 = vmov 0.0   ;;  %s2837_s23 = smov 4   ;;  %vm2086_vm2 = vcmask 1043456  }
   0xf   : > { %403 = vst.msk [vmem:[#allocation2 + $0x1] sm:$0xff] %vm333_vm0, %v2836_v0  ;;  %404 = vst.msk [vmem:[#allocation2 + $0x9] sm:$0xff] %vm333_vm0, %v2836_v0  ;;  %s2838_s24 = smov 8   ;;  %s2839_s25 = smov 12   ;;  %vm1753_vm3 = vcmask 64512   ;;  %vm1786_vm4 = vcmask 97280  }
  0x10   : > { %406 = vst.msk [vmem:[#allocation2 + $0x199] sm:$0xff] %vm333_vm0, %v2836_v0  ;;  %407 = vst.msk [vmem:[#allocation2 + $0x1a1] sm:$0xff] %vm333_vm0, %v2836_v0  ;;  %s4560_s15 = smov (!%p267_p4, %s2826_s15), 1  ;;  %s2840_s26 = smov 16   ;;  %vm1819_vm5 = vcmask 130048   ;;  %vm1852_vm6 = vcmask 162816  }
  0x11   : > { %385 = vst.msk [vmem:[#allocation2 + $0x11] sm:$0x1] %vm366_vm1, %v2836_v0  ;;  %367 = vst.msk [vmem:[#allocation2] sm:$0x1] %vm366_vm1, %v2836_v0  ;;  %s2649_s19 = sshll.u32 %s4560_s15, 8  ;;  %s2841_s27 = smov 20  }
  0x12   : > { %368 = vst.msk [vmem:[#allocation2 + $0x18] sm:$0x1] %vm366_vm1, %v2836_v0  ;;  %369 = vst.msk [vmem:[#allocation2 + $0x30] sm:$0x1] %vm366_vm1, %v2836_v0  ;;  %s2942_s22 = scalar_lea.vmem %s4404_s0, %s2649_s19  ;;  %s2842_s28 = smov 24   ;;  %vm1885_vm7 = vcmask 195584  }
  0x13   : > { %370 = vst.msk [vmem:[#allocation2 + $0x48] sm:$0x1] %vm366_vm1, %v2836_v0  ;;  %371 = vst.msk [vmem:[#allocation2 + $0x60] sm:$0x1] %vm366_vm1, %v2836_v0  ;;  %v300_v1 = vld [vmem:[%s2942_s22] sm:$0xff]  ;;  %v302_v2 = vld [vmem:[%s2942_s22 + $0x10] sm:$0xff] }
  0x14   : > { %372 = vst.msk [vmem:[#allocation2 + $0x78] sm:$0x1] %vm366_vm1, %v2836_v0  ;;  %373 = vst.msk [vmem:[#allocation2 + $0x90] sm:$0x1] %vm366_vm1, %v2836_v0  ;;  %v301_v3 = vld [vmem:[%s2942_s22 + $0x8] sm:$0xff]  ;;  %v304_v4 = vld [vmem:[%s2942_s22 + $0x20] sm:$0xff] }
  0x15   : > { %374 = vst.msk [vmem:[#allocation2 + $0xa8] sm:$0x1] %vm366_vm1, %v2836_v0  ;;  %375 = vst.msk [vmem:[#allocation2 + $0xc0] sm:$0x1] %vm366_vm1, %v2836_v0  ;;  %v303_v5 = vld [vmem:[%s2942_s22 + $0x18] sm:$0xff]  ;;  %v306_v6 = vld [vmem:[%s2942_s22 + $0x30] sm:$0xff] }
  0x16   : > { %376 = vst.msk [vmem:[#allocation2 + $0xd8] sm:$0x1] %vm366_vm1, %v2836_v0  ;;  %377 = vst.msk [vmem:[#allocation2 + $0xf0] sm:$0x1] %vm366_vm1, %v2836_v0  ;;  %v440_v7 = vld [vmem:[#allocation2 + $0x1] sm:$0xff]  ;;  %v441_v8 = vld [vmem:[#allocation2 + $0x9] sm:$0xff] }
  0x17   : > { %378 = vst.msk [vmem:[#allocation2 + $0x108] sm:$0x1] %vm366_vm1, %v2836_v0  ;;  %379 = vst.msk [vmem:[#allocation2 + $0x120] sm:$0x1] %vm366_vm1, %v2836_v0  ;;  %v305_v9 = vld [vmem:[%s2942_s22 + $0x28] sm:$0xff]  ;;  %729 = vrot.lane.b32.xlu0 %v440_v7, %s2837_s23  ;;  %v308_v10 = vld [vmem:[%s2942_s22 + $0x40] sm:$0xff] }
  0x18   : > { %380 = vst.msk [vmem:[#allocation2 + $0x138] sm:$0x1] %vm366_vm1, %v2836_v0  ;;  %381 = vst.msk [vmem:[#allocation2 + $0x150] sm:$0x1] %vm366_vm1, %v2836_v0  ;;  %v307_v11 = vld [vmem:[%s2942_s22 + $0x38] sm:$0xff]  ;;  %v310_v12 = vld [vmem:[%s2942_s22 + $0x50] sm:$0xff] }
  0x19   : > { %382 = vst.msk [vmem:[#allocation2 + $0x168] sm:$0x1] %vm366_vm1, %v2836_v0  ;;  %383 = vst.msk [vmem:[#allocation2 + $0x180] sm:$0x1] %vm366_vm1, %v2836_v0  ;;  %v309_v13 = vld [vmem:[%s2942_s22 + $0x48] sm:$0xff]  ;;  %v312_v14 = vld [vmem:[%s2942_s22 + $0x60] sm:$0xff] }
  0x1a   : > { %384 = vst.msk [vmem:[#allocation2 + $0x198] sm:$0x1] %vm366_vm1, %v2836_v0  ;;  %386 = vst.msk [vmem:[#allocation2 + $0x29] sm:$0x1] %vm366_vm1, %v2836_v0  ;;  %v311_v15 = vld [vmem:[%s2942_s22 + $0x58] sm:$0xff]  ;;  %v314_v16 = vld [vmem:[%s2942_s22 + $0x70] sm:$0xff] }
  0x1b   : > { %387 = vst.msk [vmem:[#allocation2 + $0x41] sm:$0x1] %vm366_vm1, %v2836_v0  ;;  %388 = vst.msk [vmem:[#allocation2 + $0x59] sm:$0x1] %vm366_vm1, %v2836_v0  ;;  %v313_v17 = vld [vmem:[%s2942_s22 + $0x68] sm:$0xff]  ;;  %v316_v18 = vld [vmem:[%s2942_s22 + $0x80] sm:$0xff]  ;;  %731 = vrot.lane.b32.xlu0 %v441_v8, %s2837_s23 }
  0x1c   : > { %389 = vst.msk [vmem:[#allocation2 + $0x71] sm:$0x1] %vm366_vm1, %v2836_v0  ;;  %390 = vst.msk [vmem:[#allocation2 + $0x89] sm:$0x1] %vm366_vm1, %v2836_v0  ;;  %v315_v19 = vld [vmem:[%s2942_s22 + $0x78] sm:$0xff]  ;;  %v318_v20 = vld [vmem:[%s2942_s22 + $0x90] sm:$0xff] }
  0x1d   : > { %391 = vst.msk [vmem:[#allocation2 + $0xa1] sm:$0x1] %vm366_vm1, %v2836_v0  ;;  %392 = vst.msk [vmem:[#allocation2 + $0xb9] sm:$0x1] %vm366_vm1, %v2836_v0  ;;  %v317_v21 = vld [vmem:[%s2942_s22 + $0x88] sm:$0xff]  ;;  %v320_v22 = vld [vmem:[%s2942_s22 + $0xa0] sm:$0xff] }
  0x1e   : > { %393 = vst.msk [vmem:[#allocation2 + $0xd1] sm:$0x1] %vm366_vm1, %v2836_v0  ;;  %394 = vst.msk [vmem:[#allocation2 + $0xe9] sm:$0x1] %vm366_vm1, %v2836_v0  ;;  %v319_v23 = vld [vmem:[%s2942_s22 + $0x98] sm:$0xff]  ;;  %v322_v24 = vld [vmem:[%s2942_s22 + $0xb0] sm:$0xff] }
  0x1f   : > { %395 = vst.msk [vmem:[#allocation2 + $0x101] sm:$0x1] %vm366_vm1, %v2836_v0  ;;  %396 = vst.msk [vmem:[#allocation2 + $0x119] sm:$0x1] %vm366_vm1, %v2836_v0  ;;  %v321_v28 = vld [vmem:[%s2942_s22 + $0xa8] sm:$0xff]  ;;  %v324_v29 = vld [vmem:[%s2942_s22 + $0xc0] sm:$0xff] }
  0x20   : > { %397 = vst.msk [vmem:[#allocation2 + $0x131] sm:$0x1] %vm366_vm1, %v2836_v0  ;;  %398 = vst.msk [vmem:[#allocation2 + $0x149] sm:$0x1] %vm366_vm1, %v2836_v0  ;;  %v323_v33 = vld [vmem:[%s2942_s22 + $0xb8] sm:$0xff]  ;;  %v326_v34 = vld [vmem:[%s2942_s22 + $0xd0] sm:$0xff] }
  0x21   : > { %399 = vst.msk [vmem:[#allocation2 + $0x161] sm:$0x1] %vm366_vm1, %v2836_v0  ;;  %400 = vst.msk [vmem:[#allocation2 + $0x179] sm:$0x1] %vm366_vm1, %v2836_v0  ;;  %v325_v35 = vld [vmem:[%s2942_s22 + $0xc8] sm:$0xff]  ;;  %v328_v36 = vld [vmem:[%s2942_s22 + $0xe0] sm:$0xff] }
  0x22   : > { %401 = vst.msk [vmem:[#allocation2 + $0x191] sm:$0x1] %vm366_vm1, %v2836_v0  ;;  %402 = vst.msk [vmem:[#allocation2 + $0x1a9] sm:$0x1] %vm366_vm1, %v2836_v0  ;;  %v327_v37 = vld [vmem:[%s2942_s22 + $0xd8] sm:$0xff]  ;;  %v329_v39 = vld [vmem:[%s2942_s22 + $0xe8] sm:$0xff] }
  0x23   : > { %334 = vst.msk [vmem:[#allocation2 + $0x19] sm:$0xff] %vm333_vm0, %v300_v1  ;;  %336 = vst.msk [vmem:[#allocation2 + $0x31] sm:$0xff] %vm333_vm0, %v302_v2  ;;  %v330_v58 = vld [vmem:[%s2942_s22 + $0xf0] sm:$0xff]  ;;  %v331_v62 = vld [vmem:[%s2942_s22 + $0xf8] sm:$0xff]  ;;  %s2843_s11 = smov 28   ;;  %s2844_s14 = smov 32  }
  0x24   : > { %335 = vst.msk [vmem:[#allocation2 + $0x21] sm:$0xff] %vm333_vm0, %v301_v3  ;;  %338 = vst.msk [vmem:[#allocation2 + $0x49] sm:$0xff] %vm333_vm0, %v304_v4  ;;  %v472_v0 = vld [vmem:[#allocation2 + $0x2] sm:$0xff]  ;;  %v473_v3 = vld [vmem:[#allocation2 + $0xa] sm:$0xff]  ;;  %vm1951_vm8 = vcmask 261120   ;;  %vm1918_vm9 = vcmask 228352  }
  0x25   : > { %337 = vst.msk [vmem:[#allocation2 + $0x39] sm:$0xff] %vm333_vm0, %v303_v5  ;;  %340 = vst.msk [vmem:[#allocation2 + $0x61] sm:$0xff] %vm333_vm0, %v306_v6  ;;  %vm1989_vm10 = vcmask 293888   ;;  %vm2425_vm11 = vcmask 523264  }
  0x26   : > { %339 = vst.msk [vmem:[#allocation2 + $0x51] sm:$0xff] %vm333_vm0, %v305_v9  ;;  %342 = vst.msk [vmem:[#allocation2 + $0x79] sm:$0xff] %vm333_vm0, %v308_v10 }
  0x27   : > { %341 = vst.msk [vmem:[#allocation2 + $0x69] sm:$0xff] %vm333_vm0, %v307_v11  ;;  %344 = vst.msk [vmem:[#allocation2 + $0x91] sm:$0xff] %vm333_vm0, %v310_v12 }
  0x28   : > { %343 = vst.msk [vmem:[#allocation2 + $0x81] sm:$0xff] %vm333_vm0, %v309_v13  ;;  %346 = vst.msk [vmem:[#allocation2 + $0xa9] sm:$0xff] %vm333_vm0, %v312_v14 }
  0x29   : > { %345 = vst.msk [vmem:[#allocation2 + $0x99] sm:$0xff] %vm333_vm0, %v311_v15  ;;  %348 = vst.msk [vmem:[#allocation2 + $0xc1] sm:$0xff] %vm333_vm0, %v314_v16 }
  0x2a   : > { %347 = vst.msk [vmem:[#allocation2 + $0xb1] sm:$0xff] %vm333_vm0, %v313_v17  ;;  %350 = vst.msk [vmem:[#allocation2 + $0xd9] sm:$0xff] %vm333_vm0, %v316_v18  ;;  %v2987_v25 = vld [vmem:[#allocation2 + $0x19] sm:$0xff]  ;;  %v2989_v26 = vld [vmem:[#allocation2 + $0x31] sm:$0xff] }
  0x2b   : > { %349 = vst.msk [vmem:[#allocation2 + $0xc9] sm:$0xff] %vm333_vm0, %v315_v19  ;;  %352 = vst.msk [vmem:[#allocation2 + $0xf1] sm:$0xff] %vm333_vm0, %v318_v20  ;;  %733 = vrot.lane.b32.xlu1 %v2987_v25, %s2837_s23  ;;  %v2996_v27 = vld [vmem:[#allocation2 + $0x21] sm:$0xff]  ;;  %737 = vrot.lane.b32.xlu0 %v2989_v26, %s2837_s23  ;;  %v3004_v30 = vld [vmem:[#allocation2 + $0x49] sm:$0xff] }
  0x2c   : > { %351 = vst.msk [vmem:[#allocation2 + $0xe1] sm:$0xff] %vm333_vm0, %v317_v21  ;;  %354 = vst.msk [vmem:[#allocation2 + $0x109] sm:$0xff] %vm333_vm0, %v320_v22  ;;  %v3008_v31 = vld [vmem:[#allocation2 + $0x39] sm:$0xff]  ;;  %v448_v32 = vld [vmem:[#allocation2 + $0x61] sm:$0xff] }
  0x2d   : > { %353 = vst.msk [vmem:[#allocation2 + $0xf9] sm:$0xff] %vm333_vm0, %v319_v23  ;;  %356 = vst.msk [vmem:[#allocation2 + $0x121] sm:$0xff] %vm333_vm0, %v322_v24  ;;  %v447_v38 = vld [vmem:[#allocation2 + $0x51] sm:$0xff]  ;;  %v450_v40 = vld [vmem:[#allocation2 + $0x79] sm:$0xff] }
  0x2e   : > { %355 = vst.msk [vmem:[#allocation2 + $0x111] sm:$0xff] %vm333_vm0, %v321_v28  ;;  %358 = vst.msk [vmem:[#allocation2 + $0x139] sm:$0xff] %vm333_vm0, %v324_v29  ;;  %v449_v41 = vld [vmem:[#allocation2 + $0x69] sm:$0xff]  ;;  %v452_v42 = vld [vmem:[#allocation2 + $0x91] sm:$0xff] }
  0x2f   : > { %735 = vrot.lane.b32.xlu1 %v2996_v27, %s2837_s23  ;;  %741 = vrot.lane.b32.xlu0 %v3004_v30, %s2837_s23  ;;  %357 = vst.msk [vmem:[#allocation2 + $0x129] sm:$0xff] %vm333_vm0, %v323_v33  ;;  %360 = vst.msk [vmem:[#allocation2 + $0x151] sm:$0xff] %vm333_vm0, %v326_v34  ;;  %v451_v43 = vld [vmem:[#allocation2 + $0x81] sm:$0xff]  ;;  %v454_v44 = vld [vmem:[#allocation2 + $0xa9] sm:$0xff] }
  0x30   : > { %359 = vst.msk [vmem:[#allocation2 + $0x141] sm:$0xff] %vm333_vm0, %v325_v35  ;;  %362 = vst.msk [vmem:[#allocation2 + $0x169] sm:$0xff] %vm333_vm0, %v328_v36  ;;  %v453_v45 = vld [vmem:[#allocation2 + $0x99] sm:$0xff]  ;;  %v456_v46 = vld [vmem:[#allocation2 + $0xc1] sm:$0xff] }
  0x31   : > { %361 = vst.msk [vmem:[#allocation2 + $0x159] sm:$0xff] %vm333_vm0, %v327_v37  ;;  %363 = vst.msk [vmem:[#allocation2 + $0x171] sm:$0xff] %vm333_vm0, %v329_v39  ;;  %v455_v47 = vld [vmem:[#allocation2 + $0xb1] sm:$0xff]  ;;  %v3035_v48 = vld [vmem:[#allocation2 + $0xd9] sm:$0xff] }
  0x32   : > { %v457_v49 = vld [vmem:[#allocation2 + $0xc9] sm:$0xff]  ;;  %v3040_v50 = vld [vmem:[#allocation2 + $0xf1] sm:$0xff]  ;;  %364 = vst.msk [vmem:[#allocation2 + $0x181] sm:$0xff] %vm333_vm0, %v330_v58  ;;  %365 = vst.msk [vmem:[#allocation2 + $0x189] sm:$0xff] %vm333_vm0, %v331_v62 }
  0x33   : > { %739 = vrot.lane.b32.xlu1 %v3008_v31, %s2837_s23  ;;  %745 = vrot.lane.b32.xlu0 %v448_v32, %s2837_s23  ;;  %v3043_v51 = vld [vmem:[#allocation2 + $0xe1] sm:$0xff]  ;;  %v3047_v52 = vld [vmem:[#allocation2 + $0x109] sm:$0xff]  ;;  %v3078_v4 = vld [vmem:[#allocation2 + $0x32] sm:$0xff] }
  0x34   : > { %v3051_v53 = vld [vmem:[#allocation2 + $0xf9] sm:$0xff]  ;;  %v464_v54 = vld [vmem:[#allocation2 + $0x121] sm:$0xff]  ;;  %v3085_v6 = vld [vmem:[#allocation2 + $0x4a] sm:$0xff] }
  0x35   : > { %v3057_v55 = vld [vmem:[#allocation2 + $0x111] sm:$0xff]  ;;  %v466_v56 = vld [vmem:[#allocation2 + $0x139] sm:$0xff]  ;;  %v3081_v5 = vld [vmem:[#allocation2 + $0x22] sm:$0xff] }
  0x36   : > { %v465_v57 = vld [vmem:[#allocation2 + $0x129] sm:$0xff]  ;;  %v468_v59 = vld [vmem:[#allocation2 + $0x151] sm:$0xff]  ;;  %v3073_v2 = vld [vmem:[#allocation2 + $0x1a] sm:$0xff] }
  0x37   : > { %743 = vrot.lane.b32.xlu1 %v447_v38, %s2837_s23  ;;  %749 = vrot.lane.b32.xlu0 %v450_v40, %s2837_s23  ;;  %v467_v60 = vld [vmem:[#allocation2 + $0x141] sm:$0xff]  ;;  %v470_v61 = vld [vmem:[#allocation2 + $0x169] sm:$0xff]  ;;  %v3097_v9 = vld [vmem:[#allocation2 + $0x52] sm:$0xff] }
  0x38   : > { %v469_v63 = vld [vmem:[#allocation2 + $0x159] sm:$0xff]  ;;  %v471_v1 = vld [vmem:[#allocation2 + $0x171] sm:$0xff]  ;;  %v3093_v8 = vld [vmem:[#allocation2 + $0x62] sm:$0xff] }
  0x39   : > { %v3089_v7 = vld [vmem:[#allocation2 + $0x3a] sm:$0xff]  ;;  %v3103_v11 = vld [vmem:[#allocation2 + $0x6a] sm:$0xff]  ;;  %v484_v12 = vld [vmem:[#allocation2 + $0x92] sm:$0xff] }
  0x3a   : > { %v482_v10 = vld [vmem:[#allocation2 + $0x7a] sm:$0xff]  ;;  %v483_v13 = vld [vmem:[#allocation2 + $0x82] sm:$0xff]  ;;  %v486_v14 = vld [vmem:[#allocation2 + $0xaa] sm:$0xff] }
  0x3b   : > { %747 = vrot.lane.b32.xlu1 %v449_v41, %s2837_s23  ;;  %753 = vrot.lane.b32.xlu0 %v452_v42, %s2837_s23  ;;  %v485_v15 = vld [vmem:[#allocation2 + $0x9a] sm:$0xff]  ;;  %v488_v16 = vld [vmem:[#allocation2 + $0xc2] sm:$0xff]  ;;  %v487_v17 = vld [vmem:[#allocation2 + $0xb2] sm:$0xff] }
  0x3c   : > { %v3113_v18 = vld [vmem:[#allocation2 + $0xda] sm:$0xff]  ;;  %v489_v19 = vld [vmem:[#allocation2 + $0xca] sm:$0xff]  ;;  %v3118_v20 = vld [vmem:[#allocation2 + $0xf2] sm:$0xff] }
  0x3d   : > { %v3121_v21 = vld [vmem:[#allocation2 + $0xe2] sm:$0xff]  ;;  %v3125_v22 = vld [vmem:[#allocation2 + $0x10a] sm:$0xff]  ;;  %v3129_v23 = vld [vmem:[#allocation2 + $0xfa] sm:$0xff] }
  0x3e   : > { %v3133_v24 = vld [vmem:[#allocation2 + $0x122] sm:$0xff]  ;;  %v3137_v28 = vld [vmem:[#allocation2 + $0x112] sm:$0xff]  ;;  %v498_v29 = vld [vmem:[#allocation2 + $0x13a] sm:$0xff] }
  0x3f   : > { %751 = vrot.lane.b32.xlu1 %v451_v43, %s2837_s23  ;;  %757 = vrot.lane.b32.xlu0 %v454_v44, %s2837_s23  ;;  %v3145_v33 = vld [vmem:[#allocation2 + $0x12a] sm:$0xff]  ;;  %v500_v34 = vld [vmem:[#allocation2 + $0x152] sm:$0xff]  ;;  %v499_v36 = vld [vmem:[#allocation2 + $0x142] sm:$0xff] }
  0x40   : > { %v502_v38 = vld [vmem:[#allocation2 + $0x16a] sm:$0xff]  ;;  %v501_v40 = vld [vmem:[#allocation2 + $0x15a] sm:$0xff]  ;;  %v503_v44 = vld [vmem:[#allocation2 + $0x172] sm:$0xff] }
  0x41   : > { %v3164_v43 = vld [vmem:[#allocation2 + $0x18] sm:$0xff] }
  0x43   : > { %755 = vrot.lane.b32.xlu1 %v453_v45, %s2837_s23  ;;  %761 = vrot.lane.b32.xlu0 %v456_v46, %s2837_s23 }
  0x47   : > { %759 = vrot.lane.b32.xlu1 %v455_v47, %s2837_s23  ;;  %765 = vrot.lane.b32.xlu0 %v3035_v48, %s2837_s23  ;;  %v3173_v47 = vld [vmem:[#allocation2 + $0x30] sm:$0xff] }
  0x4b   : > { %763 = vrot.lane.b32.xlu1 %v457_v49, %s2837_s23  ;;  %769 = vrot.lane.b32.xlu0 %v3040_v50, %s2837_s23 }
  0x4f   : > { %767 = vrot.lane.b32.xlu1 %v3043_v51, %s2837_s23  ;;  %773 = vrot.lane.b32.xlu0 %v3047_v52, %s2837_s23 }
  0x53   : > { %771 = vrot.lane.b32.xlu1 %v3051_v53, %s2837_s23  ;;  %777 = vrot.lane.b32.xlu0 %v464_v54, %s2837_s23  ;;  %v3179_v54 = vld [vmem:[#allocation2 + $0x20] sm:$0xff] }
  0x54   : > { %4419 = vst [vmem:[#allocation9_spill] sm:$0xff] %v3179_v54 }
  0x57   : > { %775 = vrot.lane.b32.xlu1 %v3057_v55, %s2837_s23  ;;  %781 = vrot.lane.b32.xlu0 %v466_v56, %s2837_s23 }
  0x5b   : > { %779 = vrot.lane.b32.xlu1 %v465_v57, %s2837_s23  ;;  %785 = vrot.lane.b32.xlu0 %v468_v59, %s2837_s23  ;;  %v3185_v57 = vld [vmem:[#allocation2 + $0x48] sm:$0xff]  ;;  %v3191_v59 = vld [vmem:[#allocation2 + $0x38] sm:$0xff] }
  0x5f   : > { %783 = vrot.lane.b32.xlu1 %v467_v60, %s2837_s23  ;;  %789 = vrot.lane.b32.xlu0 %v470_v61, %s2837_s23  ;;  %v3197_v61 = vld [vmem:[#allocation2 + $0x60] sm:$0xff] }
  0x63   : > { %787 = vrot.lane.b32.xlu1 %v469_v63, %s2837_s23  ;;  %857 = vrot.lane.b32.xlu0 %v472_v0, %s2838_s24  ;;  %v3203_v63 = vld [vmem:[#allocation2 + $0x50] sm:$0xff] }
  0x67   : > { %791 = vrot.lane.b32.xlu1 %v471_v1, %s2837_s23  ;;  %861 = vrot.lane.b32.xlu0 %v3073_v2, %s2838_s24  ;;  %v3209_v1 = vld [vmem:[#allocation2 + $0x78] sm:$0xff] }
  0x6b   : > { %859 = vrot.lane.b32.xlu1 %v473_v3, %s2838_s24  ;;  %865 = vrot.lane.b32.xlu0 %v3078_v4, %s2838_s24 }
  0x6f   : > { %863 = vrot.lane.b32.xlu1 %v3081_v5, %s2838_s24  ;;  %869 = vrot.lane.b32.xlu0 %v3085_v6, %s2838_s24 }
  0x73   : > { %867 = vrot.lane.b32.xlu1 %v3089_v7, %s2838_s24  ;;  %873 = vrot.lane.b32.xlu0 %v3093_v8, %s2838_s24 }
  0x77   : > { %871 = vrot.lane.b32.xlu1 %v3097_v9, %s2838_s24  ;;  %877 = vrot.lane.b32.xlu0 %v482_v10, %s2838_s24  ;;  %v3215_v10 = vld [vmem:[#allocation2 + $0x68] sm:$0xff] }
  0x7b   : > { %875 = vrot.lane.b32.xlu1 %v3103_v11, %s2838_s24  ;;  %881 = vrot.lane.b32.xlu0 %v484_v12, %s2838_s24 }
  0x7f   : > { %879 = vrot.lane.b32.xlu1 %v483_v13, %s2838_s24  ;;  %885 = vrot.lane.b32.xlu0 %v486_v14, %s2838_s24  ;;  %v420_v13 = vld [vmem:[#allocation2 + $0x90] sm:$0xff] }
  0x83   : > { %883 = vrot.lane.b32.xlu1 %v485_v15, %s2838_s24  ;;  %889 = vrot.lane.b32.xlu0 %v488_v16, %s2838_s24  ;;  %v3224_v15 = vld [vmem:[#allocation2 + $0x80] sm:$0xff] }
  0x87   : > { %887 = vrot.lane.b32.xlu1 %v487_v17, %s2838_s24  ;;  %893 = vrot.lane.b32.xlu0 %v3113_v18, %s2838_s24  ;;  %v422_v17 = vld [vmem:[#allocation2 + $0xa8] sm:$0xff] }
  0x89   : > { %v3141_v32 = vpop.permute.xlu0 %729 }
  0x8b   : > { %891 = vrot.lane.b32.xlu1 %v489_v19, %s2838_s24  ;;  %897 = vrot.lane.b32.xlu0 %v3118_v20, %s2838_s24 }
  0x8d   : > { %v3148_v35 = vpop.permute.xlu0 %731 }
  0x8f   : > { %895 = vrot.lane.b32.xlu1 %v3121_v21, %s2838_s24  ;;  %901 = vrot.lane.b32.xlu0 %v3125_v22, %s2838_s24 }
  0x93   : > { %899 = vrot.lane.b32.xlu1 %v3129_v23, %s2838_s24  ;;  %905 = vrot.lane.b32.xlu0 %v3133_v24, %s2838_s24 }
  0x97   : > { %903 = vrot.lane.b32.xlu1 %v3137_v28, %s2838_s24  ;;  %909 = vrot.lane.b32.xlu0 %v498_v29, %s2838_s24  ;;  %v421_v29 = vld [vmem:[#allocation2 + $0x98] sm:$0xff] }
  0x9b   : > { %907 = vrot.lane.b32.xlu1 %v3145_v33, %s2838_s24  ;;  %913 = vrot.lane.b32.xlu0 %v500_v34, %s2838_s24 }
  0x9d   : > { %v3153_v37 = vpop.permute.xlu1 %733  ;;  %v3155_v39 = vpop.permute.xlu0 %737 }
  0x9e   : > { %4413 = vst [vmem:[#allocation3_spill] sm:$0xff] %v3155_v39  ;;  %v3320_v39 = vld [vmem:[#allocation2 + $0x158] sm:$0xff] }
  0x9f   : > { %911 = vrot.lane.b32.xlu1 %v499_v36, %s2838_s24  ;;  %917 = vrot.lane.b32.xlu0 %v502_v38, %s2838_s24  ;;  %v3236_v36 = vld [vmem:[#allocation2 + $0xc0] sm:$0xff] }
  0xa1   : > { %v3159_v41 = vpop.permute.xlu1 %735  ;;  %v3161_v42 = vpop.permute.xlu0 %741 }
  0xa2   : > { %4414 = vst [vmem:[#allocation4_spill] sm:$0xff] %v3159_v41  ;;  %4415 = vst [vmem:[#allocation5_spill] sm:$0xff] %v3161_v42 }
  0xa3   : > { %915 = vrot.lane.b32.xlu1 %v501_v40, %s2838_s24  ;;  %985 = vrot.lane.b32.xlu0 %v3164_v43, %s2839_s25  ;;  %v423_v40 = vld [vmem:[#allocation2 + $0xb0] sm:$0xff] }
  0xa5   : > { %v3168_v45 = vpop.permute.xlu1 %739  ;;  %v3170_v46 = vpop.permute.xlu0 %745 }
  0xa6   : > { %4416 = vst [vmem:[#allocation6_spill] sm:$0xff] %v3168_v45  ;;  %4417 = vst [vmem:[#allocation7_spill] sm:$0xff] %v3170_v46  ;;  %v3281_v46 = vld [vmem:[#allocation2 + $0x120] sm:$0xff] }
  0xa7   : > { %919 = vrot.lane.b32.xlu1 %v503_v44, %s2838_s24  ;;  %989 = vrot.lane.b32.xlu0 %v3173_v47, %s2839_s25 }
  0xa9   : > { %v3177_v49 = vpop.permute.xlu1 %743  ;;  %v3181_v56 = vpop.permute.xlu0 %749 }
  0xaa   : > { %4418 = vst [vmem:[#allocation8_spill] sm:$0xff] %v3177_v49  ;;  %4420 = vst [vmem:[#allocation10_spill] sm:$0xff] %v3181_v56 }
  0xab   : > { %987 = vrot.lane.b32.xlu1 %v3179_v54, %s2839_s25  ;;  %993 = vrot.lane.b32.xlu0 %v3185_v57, %s2839_s25  ;;  %v439_v54 = vld [vmem:[#allocation2 + $0x170] sm:$0xff] }
  0xad   : > { %v3189_v58 = vpop.permute.xlu1 %747  ;;  %v3193_v60 = vpop.permute.xlu0 %753 }
  0xae   : > { %4421 = vst [vmem:[#allocation11_spill] sm:$0xff] %v3189_v58  ;;  %4422 = vst [vmem:[#allocation12_spill] sm:$0xff] %v3193_v60  ;;  %v3275_v58 = vld [vmem:[#allocation2 + $0xf8] sm:$0xff] }
  0xaf   : > { %991 = vrot.lane.b32.xlu1 %v3191_v59, %s2839_s25  ;;  %997 = vrot.lane.b32.xlu0 %v3197_v61, %s2839_s25 }
  0xb1   : > { %v3201_v62 = vpop.permute.xlu1 %751  ;;  %v3205_v0 = vpop.permute.xlu0 %757 }
  0xb2   : > { %4423 = vst [vmem:[#allocation13_spill] sm:$0xff] %v3201_v62  ;;  %4424 = vst [vmem:[#allocation14_spill] sm:$0xff] %v3205_v0  ;;  %v3257_v0 = vld [vmem:[#allocation2 + $0xf0] sm:$0xff]  ;;  %v3269_v62 = vld [vmem:[#allocation2 + $0x108] sm:$0xff] }
  0xb3   : > { %995 = vrot.lane.b32.xlu1 %v3203_v63, %s2839_s25  ;;  %1001 = vrot.lane.b32.xlu0 %v3209_v1, %s2839_s25  ;;  %4436 = vst [vmem:[#allocation26_spill] sm:$0xff] %v3269_v62 }
  0xb5   : > { %v3213_v3 = vpop.permute.xlu1 %755  ;;  %v3217_v12 = vpop.permute.xlu0 %761 }
  0xb6   : > { %4425 = vst [vmem:[#allocation15_spill] sm:$0xff] %v3213_v3  ;;  %v3263_v3 = vld [vmem:[#allocation2 + $0xe0] sm:$0xff] }
  0xb7   : > { %999 = vrot.lane.b32.xlu1 %v3215_v10, %s2839_s25  ;;  %1005 = vrot.lane.b32.xlu0 %v420_v13, %s2839_s25  ;;  %v3245_v13 = vld [vmem:[#allocation2 + $0xd8] sm:$0xff]  ;;  %4434 = vst [vmem:[#allocation24_spill] sm:$0xff] %v3263_v3 }
  0xb8   : > { %4430 = vst [vmem:[#allocation20_spill] sm:$0xff] %v3245_v13 }
  0xb9   : > { %v3222_v14 = vpop.permute.xlu1 %759  ;;  %v3226_v16 = vpop.permute.xlu0 %765 }
  0xba   : > { %4426 = vst [vmem:[#allocation16_spill] sm:$0xff] %v3222_v14 }
  0xbb   : > { %1003 = vrot.lane.b32.xlu1 %v3224_v15, %s2839_s25  ;;  %1009 = vrot.lane.b32.xlu0 %v422_v17, %s2839_s25 }
  0xbd   : > { %v3231_v19 = vpop.permute.xlu1 %763  ;;  %v3233_v34 = vpop.permute.xlu0 %769 }
  0xbe   : > { %4427 = vst [vmem:[#allocation17_spill] sm:$0xff] %v3233_v34 }
  0xbf   : > { %1007 = vrot.lane.b32.xlu1 %v421_v29, %s2839_s25  ;;  %1013 = vrot.lane.b32.xlu0 %v3236_v36, %s2839_s25  ;;  %v3251_v29 = vld [vmem:[#allocation2 + $0xc8] sm:$0xff] }
  0xc1   : > { %v3240_v38 = vpop.permute.xlu1 %767  ;;  %v3242_v44 = vpop.permute.xlu0 %773 }
  0xc2   : > { %4428 = vst [vmem:[#allocation18_spill] sm:$0xff] %v3240_v38  ;;  %4429 = vst [vmem:[#allocation19_spill] sm:$0xff] %v3242_v44  ;;  %v3299_v44 = vld [vmem:[#allocation2 + $0x128] sm:$0xff] }
  0xc3   : > { %1011 = vrot.lane.b32.xlu1 %v423_v40, %s2839_s25  ;;  %1017 = vrot.lane.b32.xlu0 %v3245_v13, %s2839_s25 }
  0xc5   : > { %v3249_v17 = vpop.permute.xlu1 %771  ;;  %v3253_v14 = vpop.permute.xlu0 %777 }
  0xc6   : > { %4431 = vst [vmem:[#allocation21_spill] sm:$0xff] %v3249_v17  ;;  %4432 = vst [vmem:[#allocation22_spill] sm:$0xff] %v3253_v14  ;;  %v3311_v17 = vld [vmem:[#allocation2 + $0x140] sm:$0xff] }
  0xc7   : > { %1015 = vrot.lane.b32.xlu1 %v3251_v29, %s2839_s25  ;;  %1021 = vrot.lane.b32.xlu0 %v3257_v0, %s2839_s25 }
  0xc9   : > { %v3261_v40 = vpop.permute.xlu1 %775  ;;  %v3265_v60 = vpop.permute.xlu0 %781 }
  0xca   : > { %4433 = vst [vmem:[#allocation23_spill] sm:$0xff] %v3261_v40  ;;  %4435 = vst [vmem:[#allocation25_spill] sm:$0xff] %v3265_v60  ;;  %v3287_v40 = vld [vmem:[#allocation2 + $0x110] sm:$0xff] }
  0xcb   : > { %1019 = vrot.lane.b32.xlu1 %v3263_v3, %s2839_s25  ;;  %1025 = vrot.lane.b32.xlu0 %v3269_v62, %s2839_s25  ;;  %v534_v3 = vld [vmem:[#allocation2 + $0x180] sm:$0xff] }
  0xcd   : > { %v3273_v56 = vpop.permute.xlu1 %779  ;;  %v3277_v14 = vpop.permute.xlu0 %785 }
  0xce   : > { %4437 = vst [vmem:[#allocation27_spill] sm:$0xff] %v3273_v56  ;;  %4438 = vst [vmem:[#allocation28_spill] sm:$0xff] %v3277_v14  ;;  %v3293_v56 = vld [vmem:[#allocation2 + $0x138] sm:$0xff] }
  0xcf   : > { %1023 = vrot.lane.b32.xlu1 %v3275_v58, %s2839_s25  ;;  %1029 = vrot.lane.b32.xlu0 %v3281_v46, %s2839_s25 }
  0xd1   : > { %v3285_v60 = vpop.permute.xlu1 %783  ;;  %v3289_v49 = vpop.permute.xlu0 %789 }
  0xd2   : > { %4439 = vst [vmem:[#allocation29_spill] sm:$0xff] %v3285_v60  ;;  %4440 = vst [vmem:[#allocation30_spill] sm:$0xff] %v3289_v49  ;;  %v3305_v60 = vld [vmem:[#allocation2 + $0x150] sm:$0xff] }
  0xd3   : > { %1027 = vrot.lane.b32.xlu1 %v3287_v40, %s2839_s25  ;;  %1033 = vrot.lane.b32.xlu0 %v3293_v56, %s2839_s25 }
  0xd5   : > { %v3297_v14 = vpop.permute.xlu1 %787  ;;  %v3301_v42 = vpop.permute.xlu0 %857 }
  0xd6   : > { %4441 = vst [vmem:[#allocation31_spill] sm:$0xff] %v3297_v14  ;;  %v438_v14 = vld [vmem:[#allocation2 + $0x168] sm:$0xff] }
  0xd7   : > { %1031 = vrot.lane.b32.xlu1 %v3299_v44, %s2839_s25  ;;  %1037 = vrot.lane.b32.xlu0 %v3305_v60, %s2839_s25 }
  0xd9   : > { %v3309_v49 = vpop.permute.xlu1 %791  ;;  %v3313_v45 = vpop.permute.xlu0 %861 }
  0xda   : > { %4442 = vst [vmem:[#allocation32_spill] sm:$0xff] %v3309_v49 }
  0xdb   : > { %1035 = vrot.lane.b32.xlu1 %v3311_v17, %s2839_s25  ;;  %1041 = vrot.lane.b32.xlu0 %v438_v14, %s2839_s25  ;;  %v535_v14 = vld [vmem:[#allocation2 + $0x188] sm:$0xff] }
  0xdd   : > { %v3318_v34 = vpop.permute.xlu1 %859  ;;  %v3322_v38 = vpop.permute.xlu0 %865 }
  0xde   : > { %4443 = vst [vmem:[#allocation33_spill] sm:$0xff] %v3322_v38 }
  0xdf   : > { %1039 = vrot.lane.b32.xlu1 %v3320_v39, %s2839_s25  ;;  %1045 = vrot.lane.b32.xlu0 %v534_v3, %s2839_s25 }
  0xe1   : > { %v3327_v49 = vpop.permute.xlu1 %863  ;;  %v3329_v41 = vpop.permute.xlu0 %869 }
  0xe2   : > { %4444 = vst [vmem:[#allocation34_spill] sm:$0xff] %v3327_v49 }
  0xe3   : > { %1043 = vrot.lane.b32.xlu1 %v439_v54, %s2839_s25  ;;  %1113 = vrot.lane.b32.xlu0 %v2987_v25, %s2840_s26 }
  0xe5   : > { %v3334_v13 = vpop.permute.xlu1 %867  ;;  %v3336_v38 = vpop.permute.xlu0 %873 }
  0xe6   : > { %4445 = vst [vmem:[#allocation35_spill] sm:$0xff] %v3336_v38 }
  0xe7   : > { %1047 = vrot.lane.b32.xlu1 %v535_v14, %s2839_s25  ;;  %1117 = vrot.lane.b32.xlu0 %v2989_v26, %s2840_s26 }
  0xe9   : > { %v3341_v3 = vpop.permute.xlu1 %871  ;;  %v3343_v49 = vpop.permute.xlu0 %877 }
  0xea   : > { %4446 = vst [vmem:[#allocation36_spill] sm:$0xff] %v3341_v3  ;;  %4447 = vst [vmem:[#allocation37_spill] sm:$0xff] %v3343_v49  ;;  %v1988_v3 = vld [vmem:[%s4405_s1 + $0x20] sm:$0xf] }
  0xeb   : > { %1115 = vrot.lane.b32.xlu1 %v2996_v27, %s2840_s26  ;;  %1121 = vrot.lane.b32.xlu0 %v3004_v30, %s2840_s26 }
  0xed   : > { %v3349_v25 = vpop.permute.xlu1 %875  ;;  %v3351_v54 = vpop.permute.xlu0 %881 }
  0xee   : > { %4448 = vst [vmem:[#allocation38_spill] sm:$0xff] %v3349_v25  ;;  %4449 = vst [vmem:[#allocation39_spill] sm:$0xff] %v3351_v54  ;;  %v1986_v54 = vld [vmem:[%s4405_s1 + $0x10] sm:$0xff] }
  0xef   : > { %1119 = vrot.lane.b32.xlu1 %v3008_v31, %s2840_s26  ;;  %1147 = vrot.lane.b32.xlu0 %v3043_v51, %s2840_s26 }
  0xf1   : > { %v3357_v14 = vpop.permute.xlu1 %879  ;;  %v3359_v38 = vpop.permute.xlu0 %885 }
  0xf2   : > { %4450 = vst [vmem:[#allocation40_spill] sm:$0xff] %v3357_v14  ;;  %4451 = vst [vmem:[#allocation41_spill] sm:$0xff] %v3359_v38  ;;  %v1987_v14 = vld [vmem:[%s4405_s1 + $0x18] sm:$0xff] }
  0xf3   : > { %1145 = vrot.lane.b32.xlu1 %v3035_v48, %s2840_s26  ;;  %1273 = vrot.lane.b32.xlu0 %v3113_v18, %s2841_s27 }
  0xf5   : > { %v3365_v27 = vpop.permute.xlu1 %883  ;;  %v3367_v30 = vpop.permute.xlu0 %889 }
  0xf6   : > { %4452 = vst [vmem:[#allocation42_spill] sm:$0xff] %v3365_v27 }
  0xf7   : > { %1241 = vrot.lane.b32.xlu1 %v3073_v2, %s2841_s27  ;;  %1275 = vrot.lane.b32.xlu0 %v3121_v21, %s2841_s27  ;;  %v1984_v2 = vld [vmem:[%s4405_s1] sm:$0xff]  ;;  %v1985_v21 = vld [vmem:[%s4405_s1 + $0x8] sm:$0xff] }
  0xf9   : > { %v3373_v51 = vpop.permute.xlu1 %887  ;;  %v3375_v38 = vpop.permute.xlu0 %893 }
  0xfa   : > { %4453 = vst [vmem:[#allocation43_spill] sm:$0xff] %v3373_v51  ;;  %v2746_v51 = vpack.c.bf16 %v1985_v21, %v1984_v2  ;;  %v2750_v21 = vpack.c.bf16 %v1987_v14, %v1986_v54 }
  0xfb   : > { %1243 = vrot.lane.b32.xlu1 %v3081_v5, %s2841_s27  ;;  %1401 = vrot.lane.b32.xlu0 %v3257_v0, %s2842_s28 }
  0xfc   : > { %2754 = vmatprep.subr.bf16.mxu1 %v2746_v51  ;;  %2747 = vmatprep.subr.bf16.mxu0 %v2746_v51 }
  0xfd   : > { %v3381_v48 = vpop.permute.xlu1 %891  ;;  %v3383_v18 = vpop.permute.xlu0 %897  ;;  %2757 = vmatpush3.bf16.msra.mxu1 %v2746_v51  ;;  %2749 = vmatpush3.bf16.msra.mxu0 %v2746_v51 }
  0xfe   : > { %2755 = vmatprep.subr.bf16.mxu1 %v2750_v21  ;;  %2751 = vmatprep.subr.bf16.mxu0 %v2750_v21 }
  0xff   : > { %1369 = vrot.lane.b32.xlu1 %v3173_v47, %s2842_s28  ;;  %1403 = vrot.lane.b32.xlu0 %v3275_v58, %s2842_s28 }
 0x101   : > { %v3395_v5 = vpop.permute.xlu1 %895  ;;  %v3397_v27 = vpop.permute.xlu0 %901  ;;  %2758 = vmatpush3.bf16.msra.mxu1 %v2750_v21  ;;  %2753 = vmatpush3.bf16.msra.mxu0 %v2750_v21 }
 0x102   : > { %4454 = vst [vmem:[#allocation44_spill] sm:$0xff] %v3397_v27  ;;  %2756 = vmatprep.subr.msk.mxu1 %vm2086_vm2, %v1988_v3  ;;  %2696 = vmatprep.subr.msk.mxu0 %vm2086_vm2, %v1988_v3  ;;  %v640_v27 = vld [vmem:[#allocation2 + $0x81] sm:$0xff] }
 0x103   : > { %1371 = vrot.lane.b32.xlu1 %v3191_v59, %s2842_s28  ;;  %1529 = vrot.lane.b32.xlu0 %v3040_v50, %s2843_s11 }
 0x105   : > { %v3409_v2 = vpop.permute.xlu1 %899  ;;  %v3411_v49 = vpop.permute.xlu0 %905  ;;  %2759 = vmatpush3.msk.msra.mxu1 %vm2086_vm2, %v1988_v3  ;;  %2697 = vmatpush3.msk.msra.mxu0 %vm2086_vm2, %v1988_v3 }
 0x106   : > { %4455 = vst [vmem:[#allocation45_spill] sm:$0xff] %v3411_v49 }
 0x107   : > { %1497 = vrot.lane.b32.xlu1 %v2989_v26, %s2843_s11  ;;  %1499 = vrot.lane.b32.xlu0 %v3008_v31, %s2843_s11 }
 0x109   : > { %v3417_v25 = vpop.permute.xlu1 %903  ;;  %v3422_v54 = vpop.permute.xlu0 %909 }
 0x10a   : > { %4456 = vst [vmem:[#allocation46_spill] sm:$0xff] %v3417_v25  ;;  %4457 = vst [vmem:[#allocation47_spill] sm:$0xff] %v3422_v54 }
 0x10b   : > { %1149 = vrot.lane.b32.xlu1 %v3040_v50, %s2840_s26  ;;  %1625 = vrot.lane.b32.xlu0 %v3078_v4, %s2844_s14 }
 0x10d   : > { %v3428_v26 = vpop.permute.xlu1 %907  ;;  %v3430_v31 = vpop.permute.xlu0 %913 }
 0x10e   : > { %4458 = vst [vmem:[#allocation48_spill] sm:$0xff] %v3428_v26  ;;  %4459 = vst [vmem:[#allocation49_spill] sm:$0xff] %v3430_v31 }
 0x10f   : > { %1531 = vrot.lane.b32.xlu1 %v3051_v53, %s2843_s11  ;;  %1151 = vrot.lane.b32.xlu0 %v3051_v53, %s2840_s26 }
 0x111   : > { %v3436_v14 = vpop.permute.xlu1 %911  ;;  %v3438_v50 = vpop.permute.xlu0 %917 }
 0x112   : > { %4460 = vst [vmem:[#allocation50_spill] sm:$0xff] %v3436_v14  ;;  %4461 = vst [vmem:[#allocation51_spill] sm:$0xff] %v3438_v50  ;;  %v636_v14 = vld [vmem:[#allocation2 + $0x51] sm:$0xff] }
 0x113   : > { %1657 = vrot.lane.b32.xlu1 %v3118_v20, %s2844_s14  ;;  %1277 = vrot.lane.b32.xlu0 %v3118_v20, %s2841_s27 }
 0x115   : > { %v3444_v51 = vpop.permute.xlu1 %915  ;;  %v3446_v3 = vpop.permute.xlu0 %985 }
 0x116   : > { %4462 = vst [vmem:[#allocation52_spill] sm:$0xff] %v3444_v51 }
 0x117   : > { %1245 = vrot.lane.b32.xlu1 %v3078_v4, %s2841_s27  ;;  %1659 = vrot.lane.b32.xlu0 %v3129_v23, %s2844_s14 }
 0x119   : > { %v3452_v53 = vpop.permute.xlu1 %919  ;;  %v3454_v21 = vpop.permute.xlu0 %989 }
 0x11a   : > { %4463 = vst [vmem:[#allocation53_spill] sm:$0xff] %v3452_v53 }
 0x11b   : > { %1627 = vrot.lane.b32.xlu1 %v3089_v7, %s2844_s14  ;;  %1279 = vrot.lane.b32.xlu0 %v3129_v23, %s2841_s27 }
 0x11d   : > { %v3460_v20 = vpop.permute.xlu1 %987  ;;  %v3462_v50 = vpop.permute.xlu0 %993 }
 0x11f   : > { %1247 = vrot.lane.b32.xlu1 %v3089_v7, %s2841_s27  ;;  %1405 = vrot.lane.b32.xlu0 %v3269_v62, %s2842_s28  ;;  %v635_v7 = vld [vmem:[#allocation2 + $0x49] sm:$0xff] }
 0x121   : > { %v3468_v4 = vpop.permute.xlu1 %991  ;;  %v3470_v53 = vpop.permute.xlu0 %997 }
 0x122   : > { %4464 = vst [vmem:[#allocation54_spill] sm:$0xff] %v3470_v53 }
 0x123   : > { %1373 = vrot.lane.b32.xlu1 %v3185_v57, %s2842_s28  ;;  %1407 = vrot.lane.b32.xlu0 %v3287_v40, %s2842_s28 }
 0x125   : > { %v3476_v23 = vpop.permute.xlu1 %995  ;;  %v3478_v51 = vpop.permute.xlu0 %1001 }
 0x126   : > { %4465 = vst [vmem:[#allocation55_spill] sm:$0xff] %v3478_v51 }
 0x127   : > { %1375 = vrot.lane.b32.xlu1 %v3203_v63, %s2842_s28  ;;  %1533 = vrot.lane.b32.xlu0 %v3047_v52, %s2843_s11 }
 0x129   : > { %v3484_v31 = vpop.permute.xlu1 %999  ;;  %v3486_v54 = vpop.permute.xlu0 %1005 }
 0x12a   : > { %4466 = vst [vmem:[#allocation56_spill] sm:$0xff] %v3484_v31  ;;  %4467 = vst [vmem:[#allocation57_spill] sm:$0xff] %v3486_v54 }
 0x12b   : > { %1501 = vrot.lane.b32.xlu1 %v635_v7, %s2843_s11  ;;  %1503 = vrot.lane.b32.xlu0 %v636_v14, %s2843_s11 }
 0x12d   : > { %v3490_v57 = vpop.permute.xlu1 %1003  ;;  %v3492_v40 = vpop.permute.xlu0 %1009 }
 0x12e   : > { %4468 = vst [vmem:[#allocation58_spill] sm:$0xff] %v3490_v57  ;;  %4469 = vst [vmem:[#allocation59_spill] sm:$0xff] %v3492_v40 }
 0x12f   : > { %1153 = vrot.lane.b32.xlu1 %v3047_v52, %s2840_s26  ;;  %1629 = vrot.lane.b32.xlu0 %v3085_v6, %s2844_s14 }
 0x131   : > { %v3498_v63 = vpop.permute.xlu1 %1007  ;;  %v3500_v26 = vpop.permute.xlu0 %1013 }
 0x132   : > { %4470 = vst [vmem:[#allocation60_spill] sm:$0xff] %v3498_v63  ;;  %4471 = vst [vmem:[#allocation61_spill] sm:$0xff] %v3500_v26 }
 0x133   : > { %1535 = vrot.lane.b32.xlu1 %v3057_v55, %s2843_s11  ;;  %1123 = vrot.lane.b32.xlu0 %v636_v14, %s2840_s26 }
 0x135   : > { %v3505_v7 = vpop.permute.xlu1 %1011  ;;  %v3507_v54 = vpop.permute.xlu0 %1017 }
 0x136   : > { %4472 = vst [vmem:[#allocation62_spill] sm:$0xff] %v3505_v7 }
 0x137   : > { %1661 = vrot.lane.b32.xlu1 %v3125_v22, %s2844_s14  ;;  %1249 = vrot.lane.b32.xlu0 %v3085_v6, %s2841_s27 }
 0x139   : > { %v3513_v52 = vpop.permute.xlu1 %1015  ;;  %v3515_v40 = vpop.permute.xlu0 %1021 }
 0x13a   : > { %4473 = vst [vmem:[#allocation63_spill] sm:$0xff] %v3513_v52 }
 0x13b   : > { %1155 = vrot.lane.b32.xlu1 %v3057_v55, %s2840_s26  ;;  %1631 = vrot.lane.b32.xlu0 %v3097_v9, %s2844_s14 }
 0x13d   : > { %v3521_v14 = vpop.permute.xlu1 %1019  ;;  %v3523_v26 = vpop.permute.xlu0 %1025 }
 0x13f   : > { %1281 = vrot.lane.b32.xlu1 %v3125_v22, %s2841_s27  ;;  %1251 = vrot.lane.b32.xlu0 %v3097_v9, %s2841_s27  ;;  %v637_v22 = vld [vmem:[#allocation2 + $0x61] sm:$0xff] }
 0x141   : > { %v3529_v6 = vpop.permute.xlu1 %1023  ;;  %v3531_v52 = vpop.permute.xlu0 %1029 }
 0x142   : > { %4474 = vst [vmem:[#allocation64_spill] sm:$0xff] %v3531_v52 }
 0x143   : > { %1663 = vrot.lane.b32.xlu1 %v3137_v28, %s2844_s14  ;;  %1377 = vrot.lane.b32.xlu0 %v3197_v61, %s2842_s28 }
 0x145   : > { %v3537_v55 = vpop.permute.xlu1 %1027  ;;  %v3539_v7 = vpop.permute.xlu0 %1033 }
 0x146   : > { %4475 = vst [vmem:[#allocation65_spill] sm:$0xff] %v3539_v7  ;;  %v638_v7 = vld [vmem:[#allocation2 + $0x69] sm:$0xff] }
 0x147   : > { %1283 = vrot.lane.b32.xlu1 %v3137_v28, %s2841_s27  ;;  %1379 = vrot.lane.b32.xlu0 %v3215_v10, %s2842_s28  ;;  %v653_v28 = vld [vmem:[#allocation2 + $0x121] sm:$0xff] }
 0x149   : > { %v3545_v9 = vpop.permute.xlu1 %1031  ;;  %v3547_v63 = vpop.permute.xlu0 %1037 }
 0x14a   : > { %4476 = vst [vmem:[#allocation66_spill] sm:$0xff] %v3545_v9  ;;  %4477 = vst [vmem:[#allocation67_spill] sm:$0xff] %v3547_v63 }
 0x14b   : > { %1409 = vrot.lane.b32.xlu1 %v3281_v46, %s2842_s28  ;;  %1505 = vrot.lane.b32.xlu0 %v637_v22, %s2843_s11 }
 0x14d   : > { %v3552_v61 = vpop.permute.xlu1 %1035  ;;  %v3554_v57 = vpop.permute.xlu0 %1041 }
 0x14e   : > { %4478 = vst [vmem:[#allocation68_spill] sm:$0xff] %v3552_v61  ;;  %4479 = vst [vmem:[#allocation69_spill] sm:$0xff] %v3554_v57  ;;  %v654_v57 = vld [vmem:[#allocation2 + $0x129] sm:$0xff] }
 0x14f   : > { %1411 = vrot.lane.b32.xlu1 %v3299_v44, %s2842_s28  ;;  %1125 = vrot.lane.b32.xlu0 %v637_v22, %s2840_s26 }
 0x151   : > { %v3559_v10 = vpop.permute.xlu1 %1039  ;;  %v3561_v49 = vpop.permute.xlu0 %1045 }
 0x152   : > { %4480 = vst [vmem:[#allocation70_spill] sm:$0xff] %v3559_v10  ;;  %4481 = vst [vmem:[#allocation71_spill] sm:$0xff] %v3561_v49 }
 0x153   : > { %1537 = vrot.lane.b32.xlu1 %v653_v28, %s2843_s11  ;;  %1507 = vrot.lane.b32.xlu0 %v638_v7, %s2843_s11 }
 0x155   : > { %v3565_v46 = vpop.permute.xlu1 %1043  ;;  %v1114_v63 = vpop.permute.xlu0 %1113 }
 0x156   : > { %4482 = vst [vmem:[#allocation72_spill] sm:$0xff] %v3565_v46 }
 0x157   : > { %1157 = vrot.lane.b32.xlu1 %v653_v28, %s2840_s26  ;;  %1633 = vrot.lane.b32.xlu0 %v3093_v8, %s2844_s14 }
 0x159   : > { %v3570_v44 = vpop.permute.xlu1 %1047  ;;  %v3572_v22 = vpop.permute.xlu0 %1117 }
 0x15a   : > { %4483 = vst [vmem:[#allocation73_spill] sm:$0xff] %v3570_v44 }
 0x15b   : > { %1539 = vrot.lane.b32.xlu1 %v654_v57, %s2843_s11  ;;  %1127 = vrot.lane.b32.xlu0 %v638_v7, %s2840_s26 }
 0x15d   : > { %v3576_v49 = vpop.permute.xlu1 %1115  ;;  %v3578_v10 = vpop.permute.xlu0 %1121 }
 0x15f   : > { %1665 = vrot.lane.b32.xlu1 %v3133_v24, %s2844_s14  ;;  %1253 = vrot.lane.b32.xlu0 %v3093_v8, %s2841_s27 }
 0x161   : > { %v3584_v28 = vpop.permute.xlu1 %1119  ;;  %v3586_v46 = vpop.permute.xlu0 %1147 }
 0x163   : > { %1159 = vrot.lane.b32.xlu1 %v654_v57, %s2840_s26  ;;  %1635 = vrot.lane.b32.xlu0 %v3103_v11, %s2844_s14 }
 0x165   : > { %v1146_v7 = vpop.permute.xlu1 %1145  ;;  %v1274_v44 = vpop.permute.xlu0 %1273 }
 0x167   : > { %1285 = vrot.lane.b32.xlu1 %v3133_v24, %s2841_s27  ;;  %1255 = vrot.lane.b32.xlu0 %v3103_v11, %s2841_s27  ;;  %v639_v11 = vld [vmem:[#allocation2 + $0x79] sm:$0xff] }
 0x169   : > { %v1242_v61 = vpop.permute.xlu1 %1241  ;;  %v3595_v51 = vpop.permute.xlu0 %1275 }
 0x16b   : > { %1667 = vrot.lane.b32.xlu1 %v3145_v33, %s2844_s14  ;;  %1381 = vrot.lane.b32.xlu0 %v3209_v1, %s2842_s28  ;;  %v408_v1 = vld [vmem:[#allocation2] sm:$0xff] }
 0x16d   : > { %v3601_v8 = vpop.permute.xlu1 %1243  ;;  %v1402_v57 = vpop.permute.xlu0 %1401 }
 0x16f   : > { %1287 = vrot.lane.b32.xlu1 %v3145_v33, %s2841_s27  ;;  %1383 = vrot.lane.b32.xlu0 %v3224_v15, %s2842_s28  ;;  %v655_v33 = vld [vmem:[#allocation2 + $0x139] sm:$0xff]  ;;  %v1721_v15 = vsel %vm333_vm0, %v408_v1, %v3141_v32  ;;  %v1737_v32 = vsel %vm333_vm0, %v3236_v36, %v3217_v12 }
 0x171   : > { %v1370_v24 = vpop.permute.xlu1 %1369  ;;  %v3607_v9 = vpop.permute.xlu0 %1403 }
 0x173   : > { %1413 = vrot.lane.b32.xlu1 %v3293_v56, %s2842_s28  ;;  %1509 = vrot.lane.b32.xlu0 %v639_v11, %s2843_s11  ;;  %v1754_v56 = vsel %vm1753_vm3, %v1721_v15, %v3301_v42 }
 0x174   : > { %v1787_v62 = vsel %vm1786_vm4, %v1754_v56, %v3446_v3  ;;  %v1770_v3 = vsel %vm1753_vm3, %v1737_v32, %v3367_v30  ;;  %v656_v56 = vld [vmem:[#allocation2 + $0x141] sm:$0xff] }
 0x175   : > { %v3612_v25 = vpop.permute.xlu1 %1371  ;;  %v1530_v31 = vpop.permute.xlu0 %1529 }
 0x177   : > { %1415 = vrot.lane.b32.xlu1 %v3311_v17, %s2842_s28  ;;  %1129 = vrot.lane.b32.xlu0 %v639_v11, %s2840_s26  ;;  %v1820_v17 = vsel %vm1819_vm5, %v1787_v62, %v1114_v63  ;;  %v671_v62 = vld [vmem:[#allocation2 + $0x7a] sm:$0xff]  ;;  %v1803_v63 = vsel %vm1786_vm4, %v1770_v3, %v3507_v54  ;;  %v409_v54 = vld [vmem:[#allocation2 + $0x8] sm:$0xff] }
 0x178   : > { %v1853_v11 = vsel %vm1852_vm6, %v1820_v17, %v1242_v61  ;;  %v1836_v61 = vsel %vm1819_vm5, %v1803_v63, %v1146_v7  ;;  %v1738_v7 = vsel %vm333_vm0, %v3251_v29, %v3231_v19 }
 0x179   : > { %v1498_v52 = vpop.permute.xlu1 %1497  ;;  %v1500_v53 = vpop.permute.xlu0 %1499  ;;  %v1886_v1 = vsel %vm1885_vm7, %v1853_v11, %v1370_v24  ;;  %v1869_v24 = vsel %vm1852_vm6, %v1836_v61, %v1274_v44  ;;  %v1771_v44 = vsel %vm1753_vm3, %v1738_v7, %v3381_v48  ;;  %v688_v61 = vld [vmem:[#allocation2 + $0x142] sm:$0xff]  ;;  %v1723_v7 = vsel %vm333_vm0, %v3164_v43, %v3153_v37 }
 0x17a   : > { %v1919_v12 = vsel %vm1918_vm9, %v1886_v1, %v1498_v52  ;;  %v1902_v52 = vsel %vm1885_vm7, %v1869_v24, %v1402_v57  ;;  %v1722_v1 = vsel %vm333_vm0, %v409_v54, %v3148_v35  ;;  %v1804_v57 = vsel %vm1786_vm4, %v1771_v44, %v3521_v14 }
 0x17b   : > { %1541 = vrot.lane.b32.xlu1 %v655_v33, %s2843_s11  ;;  %1511 = vrot.lane.b32.xlu0 %v640_v27, %s2843_s11  ;;  %v1935_v32 = vsel %vm1918_vm9, %v1902_v52, %v1530_v31  ;;  %v1755_v19 = vsel %vm1753_vm3, %v1722_v1, %v3318_v34  ;;  %v1837_v29 = vsel %vm1819_vm5, %v1804_v57, %v3586_v46  ;;  %v641_v52 = vld [vmem:[#allocation2 + $0x91] sm:$0xff] }
 0x17c   : > { %v1870_v35 = vsel %vm1852_vm6, %v1837_v29, %v3595_v51  ;;  %v657_v1 = vld [vmem:[#allocation2 + $0x151] sm:$0xff] }
 0x17d   : > { %v3630_v42 = vpop.permute.xlu1 %1149  ;;  %v1626_v36 = vpop.permute.xlu0 %1625  ;;  %v1903_v14 = vsel %vm1885_vm7, %v1870_v35, %v3607_v9 }
 0x17e   : > { %v1952_v15 = vsel %vm1951_vm8, %v1919_v12, %v1626_v36  ;;  %v672_v12 = vld [vmem:[#allocation2 + $0x82] sm:$0xff] }
 0x17f   : > { %1161 = vrot.lane.b32.xlu1 %v655_v33, %s2840_s26  ;;  %1637 = vrot.lane.b32.xlu0 %v671_v62, %s2844_s14  ;;  %v687_v33 = vld [vmem:[#allocation2 + $0x13a] sm:$0xff] }
 0x180   : > { %2698 = vmatprep.mubr.msk.f32.mxu0 %vm1989_vm10, %v1952_v15  ;;  %v609_v15 = vld [vmem:[#allocation2 + $0x90] sm:$0xff] }
 0x181   : > { %v1532_v30 = vpop.permute.xlu1 %1531  ;;  %v3644_v17 = vpop.permute.xlu0 %1151 }
 0x182   : > { %v1936_v46 = vsel %vm1918_vm9, %v1903_v14, %v1532_v30  ;;  %v610_v30 = vld [vmem:[#allocation2 + $0x98] sm:$0xff] }
 0x183   : > { %1543 = vrot.lane.b32.xlu1 %v656_v56, %s2843_s11  ;;  %1131 = vrot.lane.b32.xlu0 %v640_v27, %s2840_s26  ;;  %v1788_v27 = vsel %vm1786_vm4, %v1755_v19, %v3460_v20  ;;  %v4484_v19 = vld [vmem:[#allocation20_spill] sm:$0xff] }
 0x184   : > { %v1821_v31 = vsel %vm1819_vm5, %v1788_v27, %v3576_v49 }
 0x185   : > { %v1658_v11 = vpop.permute.xlu1 %1657  ;;  %v3660_v63 = vpop.permute.xlu0 %1277  ;;  %v1854_v34 = vsel %vm1852_vm6, %v1821_v31, %v3601_v8  ;;  %v673_v31 = vld [vmem:[#allocation2 + $0x92] sm:$0xff] }
 0x186   : > { %v1968_v3 = vsel %vm1951_vm8, %v1935_v32, %v1658_v11  ;;  %v1887_v51 = vsel %vm1885_vm7, %v1854_v34, %v3612_v25  ;;  %v1756_v11 = vsel %vm1753_vm3, %v1723_v7, %v3313_v45  ;;  %v642_v45 = vld [vmem:[#allocation2 + $0x99] sm:$0xff] }
 0x187   : > { %1669 = vrot.lane.b32.xlu1 %v687_v33, %s2844_s14  ;;  %2722 = vmatprep.mubr.msk.f32.mxu1 %vm1989_vm10, %v1968_v3  ;;  %v1789_v44 = vsel %vm1786_vm4, %v1756_v11, %v3454_v21  ;;  %v1739_v21 = vsel %vm333_vm0, %v4484_v19, %v3226_v16  ;;  %v658_v34 = vld [vmem:[#allocation2 + $0x159] sm:$0xff]  ;;  %v611_v19 = vld [vmem:[#allocation2 + $0xa8] sm:$0xff] }
 0x188   : > { %1257 = vrot.lane.b32.xlu0 %v671_v62, %s2841_s27  ;;  %v1920_v62 = vsel %vm1918_vm9, %v1887_v51, %v1500_v53 }
 0x189   : > { %v1246_v48 = vpop.permute.xlu1 %1245  ;;  %v1660_v36 = vpop.permute.xlu0 %1659 }
 0x18a   : > { %v1969_v20 = vsel %vm1951_vm8, %v1936_v46, %v1660_v36  ;;  %v4486_v46 = vld [vmem:[#allocation9_spill] sm:$0xff] }
 0x18b   : > { %1163 = vrot.lane.b32.xlu1 %v656_v56, %s2840_s26  ;;  %2723 = vmatmul.mubr.msk.f32.vlgmr.msra.gmra.mrb[0].mxu1 %vm1989_vm10, %v1969_v20  ;;  %v4487_v20 = vld [vmem:[#allocation34_spill] sm:$0xff] }
 0x18c   : > { %1639 = vrot.lane.b32.xlu0 %v672_v12, %s2844_s14 }
 0x18d   : > { %v1628_v49 = vpop.permute.xlu1 %1627  ;;  %v3688_v8 = vpop.permute.xlu0 %1279 }
 0x18e   : > { %v1953_v9 = vsel %vm1951_vm8, %v1920_v62, %v1628_v49 }
 0x18f   : > { %1289 = vrot.lane.b32.xlu1 %v687_v33, %s2841_s27  ;;  %2699 = vmatmul.mubr.msk.f32.vlgmr.msra.gmra.mrb[0].mxu0 %vm1989_vm10, %v1953_v9 }
 0x190   : > { %1259 = vrot.lane.b32.xlu0 %v672_v12, %s2841_s27 }
 0x191   : > { %v1248_v25 = vpop.permute.xlu1 %1247  ;;  %v1406_v56 = vpop.permute.xlu0 %1405 }
 0x193   : > { %1671 = vrot.lane.b32.xlu1 %v688_v61, %s2844_s14 }
 0x194   : > { %1385 = vrot.lane.b32.xlu0 %v609_v15, %s2842_s28  ;;  %v689_v15 = vld [vmem:[#allocation2 + $0x152] sm:$0xff] }
 0x195   : > { %v1374_v53 = vpop.permute.xlu1 %1373  ;;  %v3695_v24 = vpop.permute.xlu0 %1407 }
 0x197   : > { %1291 = vrot.lane.b32.xlu1 %v688_v61, %s2841_s27 }
 0x198   : > { %1387 = vrot.lane.b32.xlu0 %v610_v30, %s2842_s28 }
 0x199   : > { %v1376_v54 = vpop.permute.xlu1 %1375  ;;  %v1534_v33 = vpop.permute.xlu0 %1533 }
 0x19b   : > { %1417 = vrot.lane.b32.xlu1 %v3305_v60, %s2842_s28  ;;  %v1822_v60 = vsel %vm1819_vm5, %v1789_v44, %v3572_v22  ;;  %v1772_v22 = vsel %vm1753_vm3, %v1739_v21, %v3375_v38 }
 0x19c   : > { %1513 = vrot.lane.b32.xlu0 %v641_v52, %s2843_s11  ;;  %v1855_v57 = vsel %vm1852_vm6, %v1822_v60, %v1246_v48  ;;  %v1805_v35 = vsel %vm1786_vm4, %v1772_v22, %v3515_v40  ;;  %v4485_v40 = vld [vmem:[#allocation4_spill] sm:$0xff]  ;;  %v627_v22 = vld [vmem:[#allocation2 + $0x168] sm:$0xff] }
 0x19d   : > { %v1502_v32 = vpop.permute.xlu1 %1501  ;;  %v1504_v3 = vpop.permute.xlu0 %1503  ;;  %v1888_v43 = vsel %vm1885_vm7, %v1855_v57, %v1374_v53  ;;  %v1838_v16 = vsel %vm1819_vm5, %v1805_v35, %v3630_v42  ;;  %v1724_v36 = vsel %vm333_vm0, %v4486_v46, %v4485_v40  ;;  %v643_v35 = vld [vmem:[#allocation2 + $0xa9] sm:$0xff] }
 0x19e   : > { %v1921_v29 = vsel %vm1918_vm9, %v1888_v43, %v1502_v32  ;;  %v1871_v14 = vsel %vm1852_vm6, %v1838_v16, %v3660_v63  ;;  %v1757_v62 = vsel %vm1753_vm3, %v1724_v36, %v4487_v20  ;;  %v628_v16 = vld [vmem:[#allocation2 + $0x170] sm:$0xff] }
 0x19f   : > { %1419 = vrot.lane.b32.xlu1 %v3320_v39, %s2842_s28  ;;  %v1904_v38 = vsel %vm1885_vm7, %v1871_v14, %v1406_v56  ;;  %v1790_v49 = vsel %vm1786_vm4, %v1757_v62, %v3468_v4 }
 0x1a0   : > { %1133 = vrot.lane.b32.xlu0 %v641_v52, %s2840_s26  ;;  %v1937_v51 = vsel %vm1918_vm9, %v1904_v38, %v1534_v33  ;;  %v1823_v61 = vsel %vm1819_vm5, %v1790_v49, %v3584_v28  ;;  %v4488_v52 = vld [vmem:[#allocation18_spill] sm:$0xff]  ;;  %v4489_v33 = vld [vmem:[#allocation24_spill] sm:$0xff]  ;;  %v4492_v49 = vld [vmem:[#allocation17_spill] sm:$0xff] }
 0x1a1   : > { %v3715_v37 = vpop.permute.xlu1 %1153  ;;  %v1630_v39 = vpop.permute.xlu0 %1629  ;;  %v1856_v56 = vsel %vm1852_vm6, %v1823_v61, %v1248_v25  ;;  %v1740_v4 = vsel %vm333_vm0, %v4489_v33, %v4488_v52  ;;  %v675_v52 = vld [vmem:[#allocation2 + $0xaa] sm:$0xff] }
 0x1a2   : > { %v1954_v27 = vsel %vm1951_vm8, %v1921_v29, %v1630_v39  ;;  %v1889_v30 = vsel %vm1885_vm7, %v1856_v56, %v1376_v54  ;;  %v1773_v28 = vsel %vm1753_vm3, %v1740_v4, %v3395_v5  ;;  %v612_v29 = vld [vmem:[#allocation2 + $0xb0] sm:$0xff] }
 0x1a3   : > { %1545 = vrot.lane.b32.xlu1 %v657_v1, %s2843_s11  ;;  %2701 = vmatprep.mubr.msk.f32.mxu0 %vm1989_vm10, %v1954_v27  ;;  %v1922_v7 = vsel %vm1918_vm9, %v1889_v30, %v1504_v3  ;;  %v1806_v11 = vsel %vm1786_vm4, %v1773_v28, %v3529_v6  ;;  %v674_v3 = vld [vmem:[#allocation2 + $0x9a] sm:$0xff] }
 0x1a4   : > { %1515 = vrot.lane.b32.xlu0 %v642_v45, %s2843_s11  ;;  %v1839_v44 = vsel %vm1819_vm5, %v1806_v11, %v3644_v17  ;;  %v690_v17 = vld [vmem:[#allocation2 + $0x15a] sm:$0xff] }
 0x1a5   : > { %v1536_v48 = vpop.permute.xlu1 %1535  ;;  %v3734_v12 = vpop.permute.xlu0 %1123  ;;  %v1872_v60 = vsel %vm1852_vm6, %v1839_v44, %v3688_v8 }
 0x1a6   : > { %v1905_v5 = vsel %vm1885_vm7, %v1872_v60, %v3695_v24 }
 0x1a7   : > { %1165 = vrot.lane.b32.xlu1 %v657_v1, %s2840_s26  ;;  %v1938_v6 = vsel %vm1918_vm9, %v1905_v5, %v1536_v48 }
 0x1a8   : > { %1641 = vrot.lane.b32.xlu0 %v673_v31, %s2844_s14 }
 0x1a9   : > { %v1662_v42 = vpop.permute.xlu1 %1661  ;;  %v1250_v9 = vpop.permute.xlu0 %1249 }
 0x1aa   : > { %v1970_v63 = vsel %vm1951_vm8, %v1937_v51, %v1662_v42  ;;  %v659_v42 = vld [vmem:[#allocation2 + $0x169] sm:$0xff] }
 0x1ab   : > { %1547 = vrot.lane.b32.xlu1 %v658_v34, %s2843_s11  ;;  %2725 = vmatprep.mubr.msk.f32.mxu1 %vm1989_vm10, %v1970_v63  ;;  %v644_v63 = vld [vmem:[#allocation2 + $0xb1] sm:$0xff] }
 0x1ac   : > { %1135 = vrot.lane.b32.xlu0 %v642_v45, %s2840_s26 }
 0x1ad   : > { %v3754_v53 = vpop.permute.xlu1 %1155  ;;  %v1632_v32 = vpop.permute.xlu0 %1631 }
 0x1ae   : > { %v1955_v25 = vsel %vm1951_vm8, %v1922_v7, %v1632_v32  ;;  %v660_v7 = vld [vmem:[#allocation2 + $0x171] sm:$0xff]  ;;  %v4493_v32 = vld [vmem:[#allocation6_spill] sm:$0xff] }
 0x1af   : > { %1673 = vrot.lane.b32.xlu1 %v689_v15, %s2844_s14  ;;  %2702 = vmatmul.mubr.msk.f32.gmra.mrb[2].mxu0 %vm1989_vm10, %v1955_v25 }
 0x1b0   : > { %1261 = vrot.lane.b32.xlu0 %v673_v31, %s2841_s27  ;;  %v4490_v31 = vld [vmem:[#allocation3_spill] sm:$0xff] }
 0x1b1   : > { %v1282_v54 = vpop.permute.xlu1 %1281  ;;  %v3773_v1 = vpop.permute.xlu0 %1251  ;;  %v1725_v14 = vsel %vm333_vm0, %v3173_v47, %v4490_v31  ;;  %v614_v31 = vld [vmem:[#allocation2 + $0xc8] sm:$0xff] }
 0x1b3   : > { %1167 = vrot.lane.b32.xlu1 %v658_v34, %s2840_s26  ;;  %v4491_v34 = vld [vmem:[#allocation33_spill] sm:$0xff] }
 0x1b4   : > { %1643 = vrot.lane.b32.xlu0 %v674_v3, %s2844_s14  ;;  %v1758_v40 = vsel %vm1753_vm3, %v1725_v14, %v4491_v34 }
 0x1b5   : > { %v1664_v57 = vpop.permute.xlu1 %1663  ;;  %v1378_v45 = vpop.permute.xlu0 %1377  ;;  %v1791_v46 = vsel %vm1786_vm4, %v1758_v40, %v3462_v50  ;;  %v1741_v50 = vsel %vm333_vm0, %v3257_v0, %v4492_v49  ;;  %v645_v40 = vld [vmem:[#allocation2 + $0xc1] sm:$0xff] }
 0x1b6   : > { %v1971_v43 = vsel %vm1951_vm8, %v1938_v6, %v1664_v57  ;;  %v1824_v51 = vsel %vm1819_vm5, %v1791_v46, %v3578_v10  ;;  %v1774_v10 = vsel %vm1753_vm3, %v1741_v50, %v3383_v18  ;;  %v4494_v6 = vld [vmem:[#allocation21_spill] sm:$0xff]  ;;  %v4496_v49 = vld [vmem:[#allocation54_spill] sm:$0xff] }
 0x1b7   : > { %1293 = vrot.lane.b32.xlu1 %v689_v15, %s2841_s27  ;;  %2726 = vmatmul.mubr.msk.f32.gmra.mrb[2].mxu1 %vm1989_vm10, %v1971_v43  ;;  %v1857_v20 = vsel %vm1852_vm6, %v1824_v51, %v1250_v9  ;;  %v1807_v56 = vsel %vm1786_vm4, %v1774_v10, %v3523_v26  ;;  %v1726_v26 = vsel %vm333_vm0, %v3191_v59, %v4493_v32  ;;  %v2793_v51 = vld [vmem:[#allocation2 + $0x48] sm:$0xff] }
 0x1b8   : > { %1263 = vrot.lane.b32.xlu0 %v674_v3, %s2841_s27  ;;  %v1890_v62 = vsel %vm1885_vm7, %v1857_v20, %v1378_v45  ;;  %v1840_v0 = vsel %vm1819_vm5, %v1807_v56, %v3715_v37  ;;  %v1759_v37 = vsel %vm1753_vm3, %v1726_v26, %v3334_v13  ;;  %v691_v3 = vld [vmem:[#allocation2 + $0x16a] sm:$0xff]  ;;  %v661_v10 = vld [vmem:[#allocation2 + $0x181] sm:$0xff] }
 0x1b9   : > { %v3784_v8 = vpop.permute.xlu1 %1283  ;;  %v1380_v21 = vpop.permute.xlu0 %1379  ;;  %v1873_v33 = vsel %vm1852_vm6, %v1840_v0, %v1282_v54  ;;  %v1792_v54 = vsel %vm1786_vm4, %v1759_v37, %v3476_v23  ;;  %v1742_v23 = vsel %vm333_vm0, %v3275_v58, %v4494_v6  ;;  %v646_v0 = vld [vmem:[#allocation2 + $0xc9] sm:$0xff]  ;;  %v4501_v6 = vld [vmem:[#allocation8_spill] sm:$0xff] }
 0x1ba   : > { %v1825_v59 = vsel %vm1819_vm5, %v1792_v54, %v3734_v12  ;;  %v1775_v12 = vsel %vm1753_vm3, %v1742_v23, %v3409_v2  ;;  %v677_v54 = vld [vmem:[#allocation2 + $0xc2] sm:$0xff] }
 0x1bb   : > { %1675 = vrot.lane.b32.xlu1 %v690_v17, %s2844_s14  ;;  %v1858_v60 = vsel %vm1852_vm6, %v1825_v59, %v3773_v1  ;;  %v1808_v45 = vsel %vm1786_vm4, %v1775_v12, %v3537_v55 }
 0x1bc   : > { %1389 = vrot.lane.b32.xlu0 %v611_v19, %s2842_s28  ;;  %v1891_v5 = vsel %vm1885_vm7, %v1858_v60, %v1380_v21  ;;  %v1841_v58 = vsel %vm1819_vm5, %v1808_v45, %v3754_v53  ;;  %v676_v19 = vld [vmem:[#allocation2 + $0xb2] sm:$0xff]  ;;  %v662_v60 = vld [vmem:[#allocation2 + $0x189] sm:$0xff] }
 0x1bd   : > { %v1410_v24 = vpop.permute.xlu1 %1409  ;;  %v1506_v39 = vpop.permute.xlu0 %1505  ;;  %v1874_v21 = vsel %vm1852_vm6, %v1841_v58, %v3784_v8  ;;  %v692_v53 = vld [vmem:[#allocation2 + $0x172] sm:$0xff] }
 0x1be   : > { %v1923_v61 = vsel %vm1918_vm9, %v1890_v62, %v1506_v39  ;;  %v1906_v18 = vsel %vm1885_vm7, %v1873_v33, %v1410_v24  ;;  %v4503_v45 = vld [vmem:[#allocation56_spill] sm:$0xff] }
 0x1bf   : > { %1295 = vrot.lane.b32.xlu1 %v690_v17, %s2841_s27 }
 0x1c0   : > { %1391 = vrot.lane.b32.xlu0 %v612_v29, %s2842_s28 }
 0x1c1   : > { %v3790_v27 = vpop.permute.xlu1 %1411  ;;  %v3792_v48 = vpop.permute.xlu0 %1125 }
 0x1c2   : > { %v1907_v2 = vsel %vm1885_vm7, %v1874_v21, %v3790_v27  ;;  %v693_v21 = vld [vmem:[#allocation2 + $0x182] sm:$0xff] }
 0x1c3   : > { %1421 = vrot.lane.b32.xlu1 %v627_v22, %s2842_s28 }
 0x1c4   : > { %1517 = vrot.lane.b32.xlu0 %v643_v35, %s2843_s11 }
 0x1c5   : > { %v1538_v38 = vpop.permute.xlu1 %1537  ;;  %v1508_v36 = vpop.permute.xlu0 %1507 }
 0x1c6   : > { %v1939_v28 = vsel %vm1918_vm9, %v1906_v18, %v1538_v38  ;;  %v1924_v57 = vsel %vm1918_vm9, %v1891_v5, %v1508_v36  ;;  %v629_v38 = vld [vmem:[#allocation2 + $0x180] sm:$0xff]  ;;  %v630_v36 = vld [vmem:[#allocation2 + $0x188] sm:$0xff]  ;;  %v2794_v5 = vld [vmem:[#allocation2 + $0x50] sm:$0xff] }
 0x1c7   : > { %1423 = vrot.lane.b32.xlu1 %v628_v16, %s2842_s28  ;;  %v1728_v23 = vsel %vm333_vm0, %v2794_v5, %v4501_v6 }
 0x1c8   : > { %1137 = vrot.lane.b32.xlu0 %v643_v35, %s2840_s26  ;;  %v613_v35 = vld [vmem:[#allocation2 + $0xc0] sm:$0xff] }
 0x1c9   : > { %v3808_v47 = vpop.permute.xlu1 %1157  ;;  %v1634_v15 = vpop.permute.xlu0 %1633 }
 0x1ca   : > { %v1956_v9 = vsel %vm1951_vm8, %v1923_v61, %v1634_v15 }
 0x1cb   : > { %1549 = vrot.lane.b32.xlu1 %v659_v42, %s2843_s11  ;;  %2704 = vmatprep.mubr.msk.f32.mxu0 %vm1989_vm10, %v1956_v9 }
 0x1cc   : > { %1519 = vrot.lane.b32.xlu0 %v644_v63, %s2843_s11 }
 0x1cd   : > { %v1540_v30 = vpop.permute.xlu1 %1539  ;;  %v3826_v4 = vpop.permute.xlu0 %1127 }
 0x1ce   : > { %v1940_v55 = vsel %vm1918_vm9, %v1907_v2, %v1540_v30 }
 0x1cf   : > { %1169 = vrot.lane.b32.xlu1 %v659_v42, %s2840_s26  ;;  %v4495_v42 = vld [vmem:[#allocation5_spill] sm:$0xff] }
 0x1d0   : > { %1645 = vrot.lane.b32.xlu0 %v675_v52, %s2844_s14  ;;  %v1727_v20 = vsel %vm333_vm0, %v2793_v51, %v4495_v42 }
 0x1d1   : > { %v1666_v25 = vpop.permute.xlu1 %1665  ;;  %v1254_v44 = vpop.permute.xlu0 %1253 }
 0x1d2   : > { %v1972_v11 = vsel %vm1951_vm8, %v1939_v28, %v1666_v25  ;;  %v4500_v28 = vld [vmem:[#allocation64_spill] sm:$0xff] }
 0x1d3   : > { %1551 = vrot.lane.b32.xlu1 %v660_v7, %s2843_s11  ;;  %2728 = vmatprep.mubr.msk.f32.mxu1 %vm1989_vm10, %v1972_v11 }
 0x1d4   : > { %1139 = vrot.lane.b32.xlu0 %v644_v63, %s2840_s26  ;;  %v1760_v63 = vsel %vm1753_vm3, %v1727_v20, %v3329_v41  ;;  %v4497_v41 = vld [vmem:[#allocation19_spill] sm:$0xff] }
 0x1d5   : > { %v3847_v13 = vpop.permute.xlu1 %1159  ;;  %v1636_v43 = vpop.permute.xlu0 %1635  ;;  %v1793_v50 = vsel %vm1786_vm4, %v1760_v63, %v4496_v49 }
 0x1d6   : > { %v1957_v1 = vsel %vm1951_vm8, %v1924_v57, %v1636_v43  ;;  %v1826_v15 = vsel %vm1819_vm5, %v1793_v50, %v3792_v48  ;;  %v4499_v48 = vld [vmem:[#allocation44_spill] sm:$0xff] }
 0x1d7   : > { %1677 = vrot.lane.b32.xlu1 %v691_v3, %s2844_s14  ;;  %2705 = vmatmul.mubr.msk.f32.gmra.mrb[4].mxu0 %vm1989_vm10, %v1957_v1  ;;  %v1859_v9 = vsel %vm1852_vm6, %v1826_v15, %v1254_v44 }
 0x1d8   : > { %1265 = vrot.lane.b32.xlu0 %v675_v52, %s2841_s27  ;;  %v4498_v52 = vld [vmem:[#allocation26_spill] sm:$0xff] }
 0x1d9   : > { %v1286_v17 = vpop.permute.xlu1 %1285  ;;  %v3866_v24 = vpop.permute.xlu0 %1255  ;;  %v1743_v33 = vsel %vm333_vm0, %v4498_v52, %v4497_v41  ;;  %v647_v41 = vld [vmem:[#allocation2 + $0xd9] sm:$0xff] }
 0x1da   : > { %v1776_v32 = vsel %vm1753_vm3, %v1743_v33, %v4499_v48  ;;  %v632_v33 = vld [vmem:[#allocation2 + $0x1a0] sm:$0xff] }
 0x1db   : > { %1171 = vrot.lane.b32.xlu1 %v660_v7, %s2840_s26  ;;  %v1809_v25 = vsel %vm1786_vm4, %v1776_v32, %v4500_v28 }
 0x1dc   : > { %1647 = vrot.lane.b32.xlu0 %v676_v19, %s2844_s14  ;;  %v1842_v11 = vsel %vm1819_vm5, %v1809_v25, %v3808_v47  ;;  %v4502_v47 = vld [vmem:[#allocation36_spill] sm:$0xff]  ;;  %v648_v25 = vld [vmem:[#allocation2 + $0xe1] sm:$0xff] }
 0x1dd   : > { %v1668_v29 = vpop.permute.xlu1 %1667  ;;  %v1382_v22 = vpop.permute.xlu0 %1381  ;;  %v1875_v44 = vsel %vm1852_vm6, %v1842_v11, %v1286_v17  ;;  %v1761_v12 = vsel %vm1753_vm3, %v1728_v23, %v4502_v47  ;;  %v679_v23 = vld [vmem:[#allocation2 + $0xda] sm:$0xff] }
 0x1de   : > { %v1973_v39 = vsel %vm1951_vm8, %v1940_v55, %v1668_v29  ;;  %v1892_v30 = vsel %vm1885_vm7, %v1859_v9, %v1382_v22  ;;  %v1794_v17 = vsel %vm1786_vm4, %v1761_v12, %v4503_v45  ;;  %v4504_v22 = vld [vmem:[#allocation23_spill] sm:$0xff] }
 0x1df   : > { %1297 = vrot.lane.b32.xlu1 %v691_v3, %s2841_s27  ;;  %2729 = vmatmul.mubr.msk.f32.gmra.mrb[4].mxu1 %vm1989_vm10, %v1973_v39  ;;  %v2795_v39 = vld [vmem:[#allocation2 + $0x110] sm:$0xff] }
 0x1e0   : > { %1267 = vrot.lane.b32.xlu0 %v676_v19, %s2841_s27  ;;  %v1827_v19 = vsel %vm1819_vm5, %v1794_v17, %v3826_v4  ;;  %v4505_v4 = vld [vmem:[#allocation46_spill] sm:$0xff] }
 0x1e1   : > { %v3877_v8 = vpop.permute.xlu1 %1287  ;;  %v3879_v16 = vpop.permute.xlu0 %1383  ;;  %v1860_v2 = vsel %vm1852_vm6, %v1827_v19, %v3866_v24  ;;  %v4512_v19 = vld [vmem:[#allocation65_spill] sm:$0xff] }
 0x1e2   : > { %v1893_v29 = vsel %vm1885_vm7, %v1860_v2, %v3879_v16 }
 0x1e3   : > { %1679 = vrot.lane.b32.xlu1 %v692_v53, %s2844_s14 }
 0x1e4   : > { %1393 = vrot.lane.b32.xlu0 %v613_v35, %s2842_s28 }
 0x1e5   : > { %v1414_v27 = vpop.permute.xlu1 %1413  ;;  %v1510_v14 = vpop.permute.xlu0 %1509 }
 0x1e6   : > { %v1925_v18 = vsel %vm1918_vm9, %v1892_v30, %v1510_v14  ;;  %v1908_v3 = vsel %vm1885_vm7, %v1875_v44, %v1414_v27  ;;  %v4506_v14 = vld [vmem:[#allocation66_spill] sm:$0xff]  ;;  %v631_v30 = vld [vmem:[#allocation2 + $0x198] sm:$0xff] }
 0x1e7   : > { %1299 = vrot.lane.b32.xlu1 %v692_v53, %s2841_s27  ;;  %v1744_v53 = vsel %vm333_vm0, %v2795_v39, %v4504_v22  ;;  %v680_v39 = vld [vmem:[#allocation2 + $0xe2] sm:$0xff] }
 0x1e8   : > { %1395 = vrot.lane.b32.xlu0 %v614_v31, %s2842_s28  ;;  %v1777_v31 = vsel %vm1753_vm3, %v1744_v53, %v4505_v4  ;;  %v2798_v4 = vld [vmem:[#allocation2 + $0x68] sm:$0xff] }
 0x1e9   : > { %v3885_v34 = vpop.permute.xlu1 %1415  ;;  %v3887_v46 = vpop.permute.xlu0 %1129 }
 0x1eb   : > { %1425 = vrot.lane.b32.xlu1 %v629_v38, %s2842_s28  ;;  %v1810_v38 = vsel %vm1786_vm4, %v1777_v31, %v4506_v14  ;;  %v4513_v31 = vld [vmem:[#allocation11_spill] sm:$0xff] }
 0x1ec   : > { %1521 = vrot.lane.b32.xlu0 %v645_v40, %s2843_s11 }
 0x1ed   : > { %v1542_v62 = vpop.permute.xlu1 %1541  ;;  %v1512_v61 = vpop.permute.xlu0 %1511 }
 0x1ee   : > { %v1941_v57 = vsel %vm1918_vm9, %v1908_v3, %v1542_v62  ;;  %v1926_v35 = vsel %vm1918_vm9, %v1893_v29, %v1512_v61  ;;  %v615_v61 = vld [vmem:[#allocation2 + $0xd8] sm:$0xff] }
 0x1ef   : > { %1427 = vrot.lane.b32.xlu1 %v630_v36, %s2842_s28  ;;  %v678_v36 = vld [vmem:[#allocation2 + $0xca] sm:$0xff]  ;;  %v663_v3 = vld [vmem:[#allocation2 + $0x199] sm:$0xff] }
 0x1f0   : > { %1141 = vrot.lane.b32.xlu0 %v645_v40, %s2840_s26  ;;  %v1843_v40 = vsel %vm1819_vm5, %v1810_v38, %v3847_v13  ;;  %v694_v13 = vld [vmem:[#allocation2 + $0x18a] sm:$0xff] }
 0x1f1   : > { %v3902_v56 = vpop.permute.xlu1 %1161  ;;  %v1638_v7 = vpop.permute.xlu0 %1637  ;;  %v1876_v51 = vsel %vm1852_vm6, %v1843_v40, %v3877_v8  ;;  %v4514_v38 = vld [vmem:[#allocation38_spill] sm:$0xff] }
 0x1f2   : > { %v1958_v26 = vsel %vm1951_vm8, %v1925_v18, %v1638_v7  ;;  %v1909_v20 = vsel %vm1885_vm7, %v1876_v51, %v3885_v34  ;;  %v2796_v18 = vld [vmem:[#allocation2 + $0x60] sm:$0xff]  ;;  %v4507_v7 = vld [vmem:[#allocation7_spill] sm:$0xff] }
 0x1f3   : > { %1553 = vrot.lane.b32.xlu1 %v661_v10, %s2843_s11  ;;  %2707 = vmatprep.mubr.msk.f32.mxu0 %vm1989_vm10, %v1958_v26  ;;  %v1729_v48 = vsel %vm333_vm0, %v2796_v18, %v4507_v7  ;;  %v4508_v26 = vld [vmem:[#allocation35_spill] sm:$0xff] }
 0x1f4   : > { %1523 = vrot.lane.b32.xlu0 %v646_v0, %s2843_s11  ;;  %v1762_v28 = vsel %vm1753_vm3, %v1729_v48, %v4508_v26 }
 0x1f5   : > { %v1544_v37 = vpop.permute.xlu1 %1543  ;;  %v3920_v59 = vpop.permute.xlu0 %1131 }
 0x1f6   : > { %v1942_v62 = vsel %vm1918_vm9, %v1909_v20, %v1544_v37  ;;  %v4509_v37 = vld [vmem:[#allocation55_spill] sm:$0xff] }
 0x1f7   : > { %1173 = vrot.lane.b32.xlu1 %v661_v10, %s2840_s26  ;;  %v616_v10 = vld [vmem:[#allocation2 + $0xe0] sm:$0xff]  ;;  %v1795_v11 = vsel %vm1786_vm4, %v1762_v28, %v4509_v37 }
 0x1f8   : > { %1649 = vrot.lane.b32.xlu0 %v677_v54, %s2844_s14  ;;  %v1828_v44 = vsel %vm1819_vm5, %v1795_v11, %v3887_v46  ;;  %v4511_v46 = vld [vmem:[#allocation45_spill] sm:$0xff] }
 0x1f9   : > { %v1670_v43 = vpop.permute.xlu1 %1669 }
 0x1fa   : > { %v1974_v1 = vsel %vm1951_vm8, %v1941_v57, %v1670_v43  ;;  %v3933_v58 = vpop.permute.xlu0 %1257  ;;  %v2797_v57 = vld [vmem:[#allocation2 + $0x120] sm:$0xff]  ;;  %v4510_v43 = vld [vmem:[#allocation22_spill] sm:$0xff] }
 0x1fb   : > { %1555 = vrot.lane.b32.xlu1 %v662_v60, %s2843_s11  ;;  %2731 = vmatprep.mubr.msk.f32.mxu1 %vm1989_vm10, %v1974_v1  ;;  %v1745_v47 = vsel %vm333_vm0, %v2797_v57, %v4510_v43  ;;  %v4520_v43 = vld [vmem:[#allocation37_spill] sm:$0xff] }
 0x1fc   : > { %1143 = vrot.lane.b32.xlu0 %v646_v0, %s2840_s26  ;;  %v1778_v45 = vsel %vm1753_vm3, %v1745_v47, %v4511_v46 }
 0x1fd   : > { %v3942_v55 = vpop.permute.xlu1 %1163 }
 0x1fe   : > { %v1640_v27 = vpop.permute.xlu0 %1639 }
 0x1ff   : > { %1681 = vrot.lane.b32.xlu1 %v693_v21, %s2844_s14  ;;  %v1959_v24 = vsel %vm1951_vm8, %v1926_v35, %v1640_v27  ;;  %v695_v27 = vld [vmem:[#allocation2 + $0x19a] sm:$0xff] }
 0x200   : > { %1269 = vrot.lane.b32.xlu0 %v677_v54, %s2841_s27  ;;  %2708 = vmatmul.mubr.msk.f32.gmra.mrb[6].mxu0 %vm1989_vm10, %v1959_v24  ;;  %v1730_v24 = vsel %vm333_vm0, %v2798_v4, %v4513_v31  ;;  %v4524_v31 = vld [vmem:[#allocation67_spill] sm:$0xff] }
 0x201   : > { %v3956_v16 = vpop.permute.xlu1 %1289  ;;  %v1763_v40 = vsel %vm1753_vm3, %v1730_v24, %v4514_v38 }
 0x202   : > { %v3963_v42 = vpop.permute.xlu0 %1259 }
 0x203   : > { %1175 = vrot.lane.b32.xlu1 %v662_v60, %s2840_s26  ;;  %v1861_v60 = vsel %vm1852_vm6, %v1828_v44, %v3933_v58  ;;  %v664_v58 = vld [vmem:[#allocation2 + $0x1a1] sm:$0xff]  ;;  %s4149_s26 = scalar_lea.vmem %s4408_s4, %s2649_s19 }
 0x204   : > { %1651 = vrot.lane.b32.xlu0 %v678_v36, %s2844_s14 }
 0x205   : > { %v1672_v63 = vpop.permute.xlu1 %1671 }
 0x206   : > { %v1975_v49 = vsel %vm1951_vm8, %v1942_v62, %v1672_v63  ;;  %v1386_v50 = vpop.permute.xlu0 %1385  ;;  %v696_v63 = vld [vmem:[#allocation2 + $0x1a2] sm:$0xff] }
 0x207   : > { %1301 = vrot.lane.b32.xlu1 %v693_v21, %s2841_s27  ;;  %2732 = vmatmul.mubr.msk.f32.gmra.mrb[6].mxu1 %vm1989_vm10, %v1975_v49  ;;  %v1894_v6 = vsel %vm1885_vm7, %v1861_v60, %v1386_v50  ;;  %v1811_v21 = vsel %vm1786_vm4, %v1778_v45, %v4512_v19 }
 0x208   : > { %1271 = vrot.lane.b32.xlu0 %v678_v36, %s2841_s27  ;;  %v1844_v29 = vsel %vm1819_vm5, %v1811_v21, %v3902_v56  ;;  %v4515_v36 = vld [vmem:[#allocation58_spill] sm:$0xff]  ;;  %v2801_v21 = vld [vmem:[#allocation2 + $0x138] sm:$0xff] }
 0x209   : > { %v3974_v8 = vpop.permute.xlu1 %1291  ;;  %v1877_v22 = vsel %vm1852_vm6, %v1844_v29, %v3956_v16  ;;  %v1796_v51 = vsel %vm1786_vm4, %v1763_v40, %v4515_v36  ;;  %v4525_v36 = vld [vmem:[#allocation13_spill] sm:$0xff] }
 0x20a   : > { %v3976_v15 = vpop.permute.xlu0 %1387  ;;  %v1829_v62 = vsel %vm1819_vm5, %v1796_v51, %v3920_v59 }
 0x20b   : > { %1683 = vrot.lane.b32.xlu1 %v694_v13, %s2844_s14  ;;  %v1862_v49 = vsel %vm1852_vm6, %v1829_v62, %v3963_v42  ;;  %v4518_v42 = vld [vmem:[#allocation68_spill] sm:$0xff] }
 0x20c   : > { %1397 = vrot.lane.b32.xlu0 %v615_v61, %s2842_s28  ;;  %v2799_v61 = vld [vmem:[#allocation2 + $0x128] sm:$0xff] }
 0x20d   : > { %v1418_v34 = vpop.permute.xlu1 %1417 }
 0x20e   : > { %v1514_v9 = vpop.permute.xlu0 %1513  ;;  %v1910_v35 = vsel %vm1885_vm7, %v1877_v22, %v1418_v34  ;;  %v4516_v34 = vld [vmem:[#allocation27_spill] sm:$0xff] }
 0x20f   : > { %1303 = vrot.lane.b32.xlu1 %v694_v13, %s2841_s27  ;;  %v1927_v12 = vsel %vm1918_vm9, %v1894_v6, %v1514_v9  ;;  %v1895_v13 = vsel %vm1885_vm7, %v1862_v49, %v3976_v15 }
 0x210   : > { %1399 = vrot.lane.b32.xlu0 %v616_v10, %s2842_s28  ;;  %v1746_v10 = vsel %vm333_vm0, %v2799_v61, %v4516_v34  ;;  %v4527_v61 = vld [vmem:[#allocation60_spill] sm:$0xff] }
 0x211   : > { %v3982_v0 = vpop.permute.xlu1 %1419 }
 0x212   : > { %v3984_v52 = vpop.permute.xlu0 %1133 }
 0x213   : > { %1429 = vrot.lane.b32.xlu1 %v631_v30, %s2842_s28 }
 0x214   : > { %1525 = vrot.lane.b32.xlu0 %v647_v41, %s2843_s11  ;;  %v4517_v41 = vld [vmem:[#allocation48_spill] sm:$0xff] }
 0x215   : > { %v1546_v32 = vpop.permute.xlu1 %1545  ;;  %v1779_v59 = vsel %vm1753_vm3, %v1746_v10, %v4517_v41 }
 0x216   : > { %v1516_v54 = vpop.permute.xlu0 %1515  ;;  %v1943_v14 = vsel %vm1918_vm9, %v1910_v35, %v1546_v32  ;;  %v1812_v18 = vsel %vm1786_vm4, %v1779_v59, %v4518_v42  ;;  %v4523_v35 = vld [vmem:[#allocation47_spill] sm:$0xff]  ;;  %v2803_v59 = vld [vmem:[#allocation2 + $0x140] sm:$0xff] }
 0x217   : > { %1431 = vrot.lane.b32.xlu1 %v632_v33, %s2842_s28  ;;  %v1928_v9 = vsel %vm1918_vm9, %v1895_v13, %v1516_v54  ;;  %v1845_v15 = vsel %vm1819_vm5, %v1812_v18, %v3942_v55 }
 0x218   : > { %1527 = vrot.lane.b32.xlu0 %v648_v25, %s2843_s11  ;;  %v1878_v48 = vsel %vm1852_vm6, %v1845_v15, %v3974_v8  ;;  %v2800_v8 = vld [vmem:[#allocation2 + $0x78] sm:$0xff]  ;;  %v4529_v15 = vld [vmem:[#allocation50_spill] sm:$0xff] }
 0x219   : > { %v4000_v5 = vpop.permute.xlu1 %1165  ;;  %v1911_v26 = vsel %vm1885_vm7, %v1878_v48, %v3982_v0 }
 0x21a   : > { %v1642_v1 = vpop.permute.xlu0 %1641 }
 0x21b   : > { %1557 = vrot.lane.b32.xlu1 %v663_v3, %s2843_s11  ;;  %v1960_v17 = vsel %vm1951_vm8, %v1927_v12, %v1642_v1  ;;  %v4521_v12 = vld [vmem:[#allocation57_spill] sm:$0xff] }
 0x21c   : > { %1653 = vrot.lane.b32.xlu0 %v679_v23, %s2844_s14  ;;  %2710 = vmatprep.mubr.msk.f32.mxu0 %vm1989_vm10, %v1960_v17  ;;  %v4519_v23 = vld [vmem:[#allocation10_spill] sm:$0xff] }
 0x21d   : > { %v1548_v2 = vpop.permute.xlu1 %1547  ;;  %v1731_v57 = vsel %vm333_vm0, %v2800_v8, %v4519_v23 }
 0x21e   : > { %v4018_v53 = vpop.permute.xlu0 %1135  ;;  %v1944_v28 = vsel %vm1918_vm9, %v1911_v26, %v1548_v2  ;;  %v1764_v47 = vsel %vm1753_vm3, %v1731_v57, %v4520_v43  ;;  %v4522_v2 = vld [vmem:[#allocation25_spill] sm:$0xff] }
 0x21f   : > { %1559 = vrot.lane.b32.xlu1 %v664_v58, %s2843_s11  ;;  %v1797_v1 = vsel %vm1786_vm4, %v1764_v47, %v4521_v12  ;;  %v1747_v29 = vsel %vm333_vm0, %v2801_v21, %v4522_v2  ;;  %v4134_v47 = vld [vmem:[%s4407_s3] ss:$0 sm:$0xff] }
 0x220   : > { %1655 = vrot.lane.b32.xlu0 %v680_v39, %s2844_s14  ;;  %v1830_v45 = vsel %vm1819_vm5, %v1797_v1, %v3984_v52 }
 0x221   : > { %v1674_v56 = vpop.permute.xlu1 %1673 }
 0x222   : > { %v1976_v16 = vsel %vm1951_vm8, %v1943_v14, %v1674_v56  ;;  %v1262_v20 = vpop.permute.xlu0 %1261 }
 0x223   : > { %1685 = vrot.lane.b32.xlu1 %v695_v27, %s2844_s14  ;;  %2734 = vmatprep.mubr.msk.f32.mxu1 %vm1989_vm10, %v1976_v16  ;;  %v1863_v17 = vsel %vm1852_vm6, %v1830_v45, %v1262_v20  ;;  %v1780_v27 = vsel %vm1753_vm3, %v1747_v29, %v4523_v35  ;;  %v2802_v16 = vld [vmem:[#allocation2 + $0x80] sm:$0xff]  ;;  %v2804_v35 = vld [vmem:[#allocation2 + $0x90] sm:$0xff] }
 0x224   : > { %v1813_v52 = vsel %vm1786_vm4, %v1780_v27, %v4524_v31  ;;  %v1732_v51 = vsel %vm333_vm0, %v2802_v16, %v4525_v36  ;;  %v4531_v27 = vld [vmem:[#allocation12_spill] sm:$0xff]  ;;  %v4533_v36 = vld [vmem:[#allocation59_spill] sm:$0xff] }
 0x225   : > { %v4037_v50 = vpop.permute.xlu1 %1167  ;;  %v1846_v14 = vsel %vm1819_vm5, %v1813_v52, %v4000_v5 }
 0x226   : > { %v1644_v30 = vpop.permute.xlu0 %1643 }
 0x227   : > { %1687 = vrot.lane.b32.xlu1 %v696_v63, %s2844_s14  ;;  %v1961_v33 = vsel %vm1951_vm8, %v1928_v9, %v1644_v30  ;;  %v4526_v63 = vld [vmem:[#allocation40_spill] sm:$0xff] }
 0x228   : > { %2711 = vmatmul.mubr.msk.f32.gmra.mrb[8].mxu0 %vm1989_vm10, %v1961_v33  ;;  %v1765_v49 = vsel %vm1753_vm3, %v1732_v51, %v4526_v63  ;;  %v4528_v33 = vld [vmem:[#allocation29_spill] sm:$0xff] }
 0x229   : > { %v1294_v7 = vpop.permute.xlu1 %1293  ;;  %v1798_v5 = vsel %vm1786_vm4, %v1765_v49, %v4527_v61  ;;  %v1748_v42 = vsel %vm333_vm0, %v2803_v59, %v4528_v33  ;;  %v4535_v33 = vld [vmem:[#allocation49_spill] sm:$0xff] }
 0x22a   : > { %v1264_v32 = vpop.permute.xlu0 %1263  ;;  %v1879_v56 = vsel %vm1852_vm6, %v1846_v14, %v1294_v7  ;;  %v1831_v10 = vsel %vm1819_vm5, %v1798_v5, %v4018_v53  ;;  %v1781_v48 = vsel %vm1753_vm3, %v1748_v42, %v4529_v15  ;;  %v4532_v14 = vld [vmem:[#allocation39_spill] sm:$0xff] }
 0x22b   : > { %v1864_v9 = vsel %vm1852_vm6, %v1831_v10, %v1264_v32  ;;  %v2805_v10 = vld [vmem:[#allocation2 + $0x150] sm:$0xff] }
 0x22d   : > { %v1676_v25 = vpop.permute.xlu1 %1675 }
 0x22e   : > { %v1977_v37 = vsel %vm1951_vm8, %v1944_v28, %v1676_v25  ;;  %v1390_v11 = vpop.permute.xlu0 %1389  ;;  %v4530_v28 = vld [vmem:[#allocation70_spill] sm:$0xff] }
 0x22f   : > { %2735 = vmatmul.mubr.msk.f32.gmra.mrb[8].mxu1 %vm1989_vm10, %v1977_v37  ;;  %v1896_v19 = vsel %vm1885_vm7, %v1863_v17, %v1390_v11  ;;  %v1814_v53 = vsel %vm1786_vm4, %v1781_v48, %v4530_v28 }
 0x230   : > { %v1847_v25 = vsel %vm1819_vm5, %v1814_v53, %v4037_v50 }
 0x231   : > { %v1296_v54 = vpop.permute.xlu1 %1295 }
 0x232   : > { %v1392_v44 = vpop.permute.xlu0 %1391  ;;  %v1880_v37 = vsel %vm1852_vm6, %v1847_v25, %v1296_v54  ;;  %v4129_v54 = vld [vmem:[%s4406_s2] ss:$0 sm:$0xff]  ;;  %v2806_v25 = vld [vmem:[#allocation2 + $0x98] sm:$0xff] }
 0x233   : > { %v1897_v41 = vsel %vm1885_vm7, %v1864_v9, %v1392_v44  ;;  %v4534_v9 = vld [vmem:[#allocation28_spill] sm:$0xff] }
 0x235   : > { %v1422_v3 = vpop.permute.xlu1 %1421 }
 0x236   : > { %v1518_v60 = vpop.permute.xlu0 %1517  ;;  %v1912_v40 = vsel %vm1885_vm7, %v1879_v56, %v1422_v3 }
 0x237   : > { %v1929_v39 = vsel %vm1918_vm9, %v1896_v19, %v1518_v60 }
 0x239   : > { %v1424_v55 = vpop.permute.xlu1 %1423 }
 0x23a   : > { %v4060_v6 = vpop.permute.xlu0 %1137  ;;  %v1913_v44 = vsel %vm1885_vm7, %v1880_v37, %v1424_v55  ;;  %v4537_v37 = vld [vmem:[#allocation15_spill] sm:$0xff] }
 0x23d   : > { %v1550_v0 = vpop.permute.xlu1 %1549 }
 0x23e   : > { %v1520_v46 = vpop.permute.xlu0 %1519  ;;  %v1945_v20 = vsel %vm1918_vm9, %v1912_v40, %v1550_v0 }
 0x23f   : > { %v1930_v18 = vsel %vm1918_vm9, %v1897_v41, %v1520_v46  ;;  %v1749_v41 = vsel %vm333_vm0, %v2805_v10, %v4534_v9  ;;  %v4543_v10 = vld [vmem:[#allocation14_spill] sm:$0xff] }
 0x240   : > { %v1782_v42 = vsel %vm1753_vm3, %v1749_v41, %v4535_v33 }
 0x241   : > { %v4071_v58 = vpop.permute.xlu1 %1169 }
 0x242   : > { %v1646_v22 = vpop.permute.xlu0 %1645 }
 0x243   : > { %v1962_v4 = vsel %vm1951_vm8, %v1929_v39, %v1646_v22 }
 0x244   : > { %2713 = vmatprep.mubr.msk.f32.mxu0 %vm1989_vm10, %v1962_v4  ;;  %v1733_v4 = vsel %vm333_vm0, %v2804_v35, %v4531_v27  ;;  %v4542_v27 = vld [vmem:[#allocation72_spill] sm:$0xff] }
 0x245   : > { %v1552_v24 = vpop.permute.xlu1 %1551  ;;  %v1766_v56 = vsel %vm1753_vm3, %v1733_v4, %v4532_v14 }
 0x246   : > { %v4086_v38 = vpop.permute.xlu0 %1139  ;;  %v1946_v3 = vsel %vm1918_vm9, %v1913_v44, %v1552_v24  ;;  %v1799_v51 = vsel %vm1786_vm4, %v1766_v56, %v4533_v36  ;;  %v1734_v44 = vsel %vm333_vm0, %v2806_v25, %v4537_v37  ;;  %v2809_v37 = vld [vmem:[#allocation2 + $0xb0] sm:$0xff] }
 0x247   : > { %v1832_v63 = vsel %vm1819_vm5, %v1799_v51, %v4060_v6 }
 0x249   : > { %v1678_v62 = vpop.permute.xlu1 %1677 }
 0x24a   : > { %v1978_v13 = vsel %vm1951_vm8, %v1945_v20, %v1678_v62  ;;  %v1266_v34 = vpop.permute.xlu0 %1265 }
 0x24b   : > { %2737 = vmatprep.mubr.msk.f32.mxu1 %vm1989_vm10, %v1978_v13  ;;  %v1865_v13 = vsel %vm1852_vm6, %v1832_v63, %v1266_v34 }
 0x24d   : > { %v4101_v30 = vpop.permute.xlu1 %1171 }
 0x24e   : > { %v1648_v7 = vpop.permute.xlu0 %1647 }
 0x24f   : > { %v1963_v26 = vsel %vm1951_vm8, %v1930_v18, %v1648_v7  ;;  %v4536_v18 = vld [vmem:[#allocation69_spill] sm:$0xff] }
 0x250   : > { %2714 = vmatmul.mubr.msk.f32.gmra.mrb[10].mxu0 %vm1989_vm10, %v1963_v26  ;;  %v1815_v7 = vsel %vm1786_vm4, %v1782_v42, %v4536_v18  ;;  %v4545_v18 = vld [vmem:[#allocation61_spill] sm:$0xff] }
 0x251   : > { %v1298_v32 = vpop.permute.xlu1 %1297  ;;  %v1848_v48 = vsel %vm1819_vm5, %v1815_v7, %v4071_v58 }
 0x252   : > { %v4116_v11 = vpop.permute.xlu0 %1267  ;;  %v1881_v26 = vsel %vm1852_vm6, %v1848_v48, %v1298_v32 }
 0x255   : > { %v1680_v60 = vpop.permute.xlu1 %1679 }
 0x256   : > { %v1979_v8 = vsel %vm1951_vm8, %v1946_v3, %v1680_v60  ;;  %v1394_v23 = vpop.permute.xlu0 %1393 }
 0x257   : > { %2738 = vmatmul.mubr.msk.f32.gmra.mrb[10].mxu1 %vm1989_vm10, %v1979_v8  ;;  %v1898_v5 = vsel %vm1885_vm7, %v1865_v13, %v1394_v23  ;;  %v4538_v8 = vld [vmem:[#allocation42_spill] sm:$0xff] }
 0x258   : > { %v1767_v23 = vsel %vm1753_vm3, %v1734_v44, %v4538_v8  ;;  %v4546_v44 = vld [vmem:[#allocation16_spill] sm:$0xff] }
 0x259   : > { %v4122_v57 = vpop.permute.xlu1 %1299 }
 0x25a   : > { %v4124_v0 = vpop.permute.xlu0 %1395 }
 0x25d   : > { %v1426_v50 = vpop.permute.xlu1 %1425 }
 0x25e   : > { %v1522_v55 = vpop.permute.xlu0 %1521  ;;  %v2724_v43 = vpop.f32.mrb[0].mxu1  ;;  %v1914_v53 = vsel %vm1885_vm7, %v1881_v26, %v1426_v50 }
 0x25f   : > { %v2339_v12 = vmul.f32 %v2724_v43, %v4129_v54  ;;  %v2236_v1 = vpop.f32.mrb[1].mxu1  ;;  %v1931_v59 = vsel %vm1918_vm9, %v1898_v5, %v1522_v55  ;;  %v4539_v43 = vld [vmem:[#allocation62_spill] sm:$0xff] }
 0x260   : > { %v2338_v45 = vmul.f32 %v4129_v54, %v2236_v1  ;;  %v1800_v58 = vsel %vm1786_vm4, %v1767_v23, %v4539_v43  ;;  %v2808_v5 = vld [vmem:[#allocation2 + $0xa8] sm:$0xff] }
 0x261   : > { %v4137_v46 = vpop.permute.xlu1 %1427  ;;  %v2378_v19 = vadd.f32 %v4134_v47, %v2339_v12  ;;  %v1833_v50 = vsel %vm1819_vm5, %v1800_v58, %v4086_v38  ;;  %v1735_v9 = vsel %vm333_vm0, %v2808_v5, %v4543_v10 }
 0x262   : > { %v2700_v17 = vpop.f32.mrb[0].mxu0  ;;  %v4142_v2 = vpop.permute.xlu0 %1141  ;;  %v2377_v39 = vadd.f32 %v4134_v47, %v2338_v45  ;;  %v1866_v12 = vsel %vm1852_vm6, %v1833_v50, %v4116_v11  ;;  %v2810_v50 = vld [vmem:[#allocation2 + $0x168] sm:$0xff] }
 0x263   : > { %v2323_v21 = vmul.f32 %v2700_v17, %v4129_v54  ;;  %v2156_v29 = vpop.f32.mrb[1].mxu0  ;;  %v2410_v31 = vmax.f32 %v2378_v19, 0.0  ;;  %v1899_v45 = vsel %vm1885_vm7, %v1866_v12, %v4124_v0  ;;  %v2807_v17 = vld [vmem:[#allocation2 + $0x158] sm:$0xff]  ;;  %v4540_v19 = vld [vmem:[#allocation31_spill] sm:$0xff]  ;;  %v4548_v12 = vld [vmem:[#allocation30_spill] sm:$0xff] }
 0x264   : > { %v2322_v22 = vmul.f32 %v4129_v54, %v2156_v29  ;;  %v2409_v40 = vmax.f32 %v2377_v39, 0.0 }
 0x265   : > { %v2362_v52 = vadd.f32 %v4134_v47, %v2323_v21  ;;  %v1554_v24 = vpop.permute.xlu1 %1553  ;;  %2443 = vst.msk [vmem:[%s4149_s26 + $0x88] sm:$0xff] %vm2425_vm11, %v2410_v31  ;;  %v1750_v21 = vsel %vm333_vm0, %v2807_v17, %v4540_v19  ;;  %v4549_v17 = vld [vmem:[#allocation63_spill] sm:$0xff] }
 0x266   : > { %v2361_v16 = vadd.f32 %v4134_v47, %v2322_v22  ;;  %v1524_v62 = vpop.permute.xlu0 %1523  ;;  %2442 = vst.msk [vmem:[%s4149_s26 + $0x80] sm:$0xff] %vm2425_vm11, %v2409_v40  ;;  %v1947_v3 = vsel %vm1918_vm9, %v1914_v53, %v1554_v24  ;;  %v4541_v22 = vld [vmem:[#allocation52_spill] sm:$0xff] }
 0x267   : > { %v2394_v20 = vmax.f32 %v2362_v52, 0.0  ;;  %v1932_v29 = vsel %vm1918_vm9, %v1899_v45, %v1524_v62  ;;  %v1783_v35 = vsel %vm1753_vm3, %v1750_v21, %v4541_v22  ;;  %v1751_v45 = vsel %vm333_vm0, %v2810_v50, %v4548_v12 }
 0x268   : > { %v2393_v49 = vmax.f32 %v2361_v16, 0.0  ;;  %v1816_v11 = vsel %vm1786_vm4, %v1783_v35, %v4542_v27 }
 0x269   : > { %2427 = vst.msk [vmem:[%s4149_s26 + $0x8] sm:$0xff] %vm2425_vm11, %v2394_v20  ;;  %v4170_v61 = vpop.permute.xlu1 %1173  ;;  %v1849_v0 = vsel %vm1819_vm5, %v1816_v11, %v4101_v30  ;;  %v4551_v11 = vld [vmem:[#allocation71_spill] sm:$0xff] }
 0x26a   : > { %2426 = vst.msk [vmem:[%s4149_s26] sm:$0xff] %vm2425_vm11, %v2393_v49  ;;  %v1650_v6 = vpop.permute.xlu0 %1649  ;;  %v1882_v31 = vsel %vm1852_vm6, %v1849_v0, %v4122_v57 }
 0x26b   : > { %v1964_v34 = vsel %vm1951_vm8, %v1931_v59, %v1650_v6  ;;  %v1915_v24 = vsel %vm1885_vm7, %v1882_v31, %v4137_v46  ;;  %v4544_v6 = vld [vmem:[#allocation41_spill] sm:$0xff] }
 0x26c   : > { %2716 = vmatprep.mubr.msk.f32.mxu0 %vm1989_vm10, %v1964_v34  ;;  %v1768_v33 = vsel %vm1753_vm3, %v1735_v9, %v4544_v6 }
 0x26d   : > { %v1556_v15 = vpop.permute.xlu1 %1555  ;;  %v1801_v7 = vsel %vm1786_vm4, %v1768_v33, %v4545_v18 }
 0x26e   : > { %v4187_v28 = vpop.permute.xlu0 %1143  ;;  %v1948_v14 = vsel %vm1918_vm9, %v1915_v24, %v1556_v15  ;;  %v1834_v53 = vsel %vm1819_vm5, %v1801_v7, %v4142_v2 }
 0x271   : > { %v1682_v60 = vpop.permute.xlu1 %1681 }
 0x272   : > { %v1980_v55 = vsel %vm1951_vm8, %v1947_v3, %v1682_v60  ;;  %v1270_v32 = vpop.permute.xlu0 %1269  ;;  %v1736_v3 = vsel %vm333_vm0, %v2809_v37, %v4546_v44 }
 0x273   : > { %2740 = vmatprep.mubr.msk.f32.mxu1 %vm1989_vm10, %v1980_v55  ;;  %v1867_v60 = vsel %vm1852_vm6, %v1834_v53, %v1270_v32  ;;  %v4547_v55 = vld [vmem:[#allocation43_spill] sm:$0xff] }
 0x274   : > { %v1769_v43 = vsel %vm1753_vm3, %v1736_v3, %v4547_v55 }
 0x275   : > { %v4203_v1 = vpop.permute.xlu1 %1175  ;;  %v1802_v19 = vsel %vm1786_vm4, %v1769_v43, %v4549_v17 }
 0x276   : > { %v1652_v39 = vpop.permute.xlu0 %1651  ;;  %v1835_v35 = vsel %vm1819_vm5, %v1802_v19, %v4187_v28  ;;  %v2811_v28 = vld [vmem:[#allocation2 + $0x170] sm:$0xff] }
 0x277   : > { %v1965_v38 = vsel %vm1951_vm8, %v1932_v29, %v1652_v39  ;;  %v4550_v39 = vld [vmem:[#allocation51_spill] sm:$0xff] }
 0x278   : > { %2717 = vmatmul.mubr.msk.f32.gmra.mrb[12].mxu0 %vm1989_vm10, %v1965_v38  ;;  %v1784_v22 = vsel %vm1753_vm3, %v1751_v45, %v4550_v39 }
 0x279   : > { %v4215_v4 = vpop.permute.xlu1 %1301  ;;  %v1817_v0 = vsel %vm1786_vm4, %v1784_v22, %v4551_v11 }
 0x27a   : > { %v1272_v52 = vpop.permute.xlu0 %1271 }
 0x27b   : > { %v1868_v31 = vsel %vm1852_vm6, %v1835_v35, %v1272_v52 }
 0x27d   : > { %v1684_v56 = vpop.permute.xlu1 %1683 }
 0x27e   : > { %v1981_v40 = vsel %vm1951_vm8, %v1948_v14, %v1684_v56  ;;  %v1398_v16 = vpop.permute.xlu0 %1397  ;;  %v1850_v14 = vsel %vm1819_vm5, %v1817_v0, %v4170_v61 }
 0x27f   : > { %2741 = vmatmul.mubr.msk.f32.gmra.mrb[12].mxu1 %vm1989_vm10, %v1981_v40  ;;  %v1900_v58 = vsel %vm1885_vm7, %v1867_v60, %v1398_v16  ;;  %v4552_v40 = vld [vmem:[#allocation32_spill] sm:$0xff] }
 0x280   : > { %v1752_v16 = vsel %vm333_vm0, %v2811_v28, %v4552_v40 }
 0x281   : > { %v4227_v36 = vpop.permute.xlu1 %1303 }
 0x282   : > { %v1400_v51 = vpop.permute.xlu0 %1399  ;;  %v2703_v20 = vpop.f32.mrb[2].mxu0 }
 0x283   : > { %v2325_v30 = vmul.f32 %v2703_v20, %v4129_v54  ;;  %v2166_v62 = vpop.f32.mrb[3].mxu0  ;;  %v1901_v56 = vsel %vm1885_vm7, %v1868_v31, %v1400_v51  ;;  %v1883_v20 = vsel %vm1852_vm6, %v1850_v14, %v4215_v4  ;;  %v4554_v51 = vld [vmem:[#allocation73_spill] sm:$0xff] }
 0x284   : > { %v2324_v63 = vmul.f32 %v4129_v54, %v2166_v62  ;;  %v4553_v62 = vld [vmem:[#allocation53_spill] sm:$0xff] }
 0x285   : > { %v1430_v57 = vpop.permute.xlu1 %1429  ;;  %v2364_v46 = vadd.f32 %v4134_v47, %v2325_v30 }
 0x286   : > { %v1526_v49 = vpop.permute.xlu0 %1525  ;;  %v2363_v13 = vadd.f32 %v4134_v47, %v2324_v63  ;;  %v1785_v63 = vsel %vm1753_vm3, %v1752_v16, %v4553_v62 }
 0x287   : > { %v2396_v41 = vmax.f32 %v2364_v46, 0.0  ;;  %v1933_v32 = vsel %vm1918_vm9, %v1900_v58, %v1526_v49  ;;  %v1916_v46 = vsel %vm1885_vm7, %v1883_v20, %v1430_v57  ;;  %v1818_v49 = vsel %vm1786_vm4, %v1785_v63, %v4554_v51 }
 0x288   : > { %v2395_v42 = vmax.f32 %v2363_v13, 0.0  ;;  %v1851_v4 = vsel %vm1819_vm5, %v1818_v49, %v4203_v1 }
 0x289   : > { %v1432_v59 = vpop.permute.xlu1 %1431  ;;  %2429 = vst.msk [vmem:[%s4149_s26 + $0x18] sm:$0xff] %vm2425_vm11, %v2396_v41  ;;  %v1884_v9 = vsel %vm1852_vm6, %v1851_v4, %v4227_v36 }
 0x28a   : > { %v2727_v34 = vpop.f32.mrb[2].mxu1  ;;  %v1528_v48 = vpop.permute.xlu0 %1527  ;;  %2428 = vst.msk [vmem:[%s4149_s26 + $0x10] sm:$0xff] %vm2425_vm11, %v2395_v42  ;;  %v1917_v57 = vsel %vm1885_vm7, %v1884_v9, %v1432_v59 }
 0x28b   : > { %v2341_v15 = vmul.f32 %v2727_v34, %v4129_v54  ;;  %v2246_v26 = vpop.f32.mrb[3].mxu1  ;;  %v1934_v52 = vsel %vm1918_vm9, %v1901_v56, %v1528_v48 }
 0x28c   : > { %v2340_v25 = vmul.f32 %v4129_v54, %v2246_v26 }
 0x28d   : > { %v2380_v8 = vadd.f32 %v4134_v47, %v2341_v15  ;;  %v1558_v23 = vpop.permute.xlu1 %1557 }
 0x28e   : > { %v2379_v2 = vadd.f32 %v4134_v47, %v2340_v25  ;;  %v1654_v29 = vpop.permute.xlu0 %1653  ;;  %v1949_v13 = vsel %vm1918_vm9, %v1916_v46, %v1558_v23 }
 0x28f   : > { %v2412_v21 = vmax.f32 %v2380_v8, 0.0  ;;  %v1966_v27 = vsel %vm1951_vm8, %v1933_v32, %v1654_v29 }
 0x290   : > { %v2411_v38 = vmax.f32 %v2379_v2, 0.0  ;;  %2719 = vmatprep.mubr.msk.f32.mxu0 %vm1989_vm10, %v1966_v27 }
 0x291   : > { %2445 = vst.msk [vmem:[%s4149_s26 + $0x98] sm:$0xff] %vm2425_vm11, %v2412_v21  ;;  %v1560_v24 = vpop.permute.xlu1 %1559 }
 0x292   : > { %2444 = vst.msk [vmem:[%s4149_s26 + $0x90] sm:$0xff] %vm2425_vm11, %v2411_v38  ;;  %v1656_v30 = vpop.permute.xlu0 %1655  ;;  %v1950_v41 = vsel %vm1918_vm9, %v1917_v57, %v1560_v24 }
 0x293   : > { %v1967_v61 = vsel %vm1951_vm8, %v1934_v52, %v1656_v30 }
 0x294   : > { %2720 = vmatmul.mubr.msk.f32.gmra.mrb[14].mxu0 %vm1989_vm10, %v1967_v61 }
 0x295   : > { %v1686_v5 = vpop.permute.xlu1 %1685 }
 0x296   : > { %v1982_v10 = vsel %vm1951_vm8, %v1949_v13, %v1686_v5 }
 0x297   : > { %2743 = vmatprep.mubr.msk.f32.mxu1 %vm1989_vm10, %v1982_v10 }
 0x299   : > { %v1688_v6 = vpop.permute.xlu1 %1687 }
 0x29a   : > { %v1983_v33 = vsel %vm1951_vm8, %v1950_v41, %v1688_v6 }
 0x29b   : > { %2744 = vmatmul.mubr.msk.f32.gmra.mrb[14].mxu1 %vm1989_vm10, %v1983_v33 }
 0x2aa   : > { %v2706_v42 = vpop.f32.mrb[4].mxu0 }
 0x2ab   : > { %v2327_v1 = vmul.f32 %v2706_v42, %v4129_v54  ;;  %v2176_v34 = vpop.f32.mrb[5].mxu0 }
 0x2ac   : > { %v2326_v36 = vmul.f32 %v4129_v54, %v2176_v34 }
 0x2ad   : > { %v2366_v18 = vadd.f32 %v4134_v47, %v2327_v1 }
 0x2ae   : > { %v2365_v59 = vadd.f32 %v4134_v47, %v2326_v36 }
 0x2af   : > { %v2398_v7 = vmax.f32 %v2366_v18, 0.0 }
 0x2b0   : > { %v2397_v15 = vmax.f32 %v2365_v59, 0.0 }
 0x2b1   : > { %2431 = vst.msk [vmem:[%s4149_s26 + $0x28] sm:$0xff] %vm2425_vm11, %v2398_v7 }
 0x2b2   : > { %v2730_v48 = vpop.f32.mrb[4].mxu1  ;;  %2430 = vst.msk [vmem:[%s4149_s26 + $0x20] sm:$0xff] %vm2425_vm11, %v2397_v15 }
 0x2b3   : > { %v2343_v26 = vmul.f32 %v2730_v48, %v4129_v54  ;;  %v2256_v53 = vpop.f32.mrb[5].mxu1 }
 0x2b4   : > { %v2342_v25 = vmul.f32 %v4129_v54, %v2256_v53 }
 0x2b5   : > { %v2382_v37 = vadd.f32 %v4134_v47, %v2343_v26 }
 0x2b6   : > { %v2381_v44 = vadd.f32 %v4134_v47, %v2342_v25 }
 0x2b7   : > { %v2414_v3 = vmax.f32 %v2382_v37, 0.0 }
 0x2b8   : > { %v2413_v60 = vmax.f32 %v2381_v44, 0.0 }
 0x2b9   : > { %2447 = vst.msk [vmem:[%s4149_s26 + $0xa8] sm:$0xff] %vm2425_vm11, %v2414_v3 }
 0x2ba   : > { %2446 = vst.msk [vmem:[%s4149_s26 + $0xa0] sm:$0xff] %vm2425_vm11, %v2413_v60 }
 0x2d3   : > { %v2709_v8 = vpop.f32.mrb[6].mxu0 }
 0x2d4   : > { %v2329_v23 = vmul.f32 %v2709_v8, %v4129_v54  ;;  %v2186_v55 = vpop.f32.mrb[7].mxu0 }
 0x2d5   : > { %v2328_v43 = vmul.f32 %v4129_v54, %v2186_v55 }
 0x2d6   : > { %v2368_v58 = vadd.f32 %v4134_v47, %v2329_v23 }
 0x2d7   : > { %v2367_v2 = vadd.f32 %v4134_v47, %v2328_v43 }
 0x2d8   : > { %v2400_v50 = vmax.f32 %v2368_v58, 0.0 }
 0x2d9   : > { %v2399_v12 = vmax.f32 %v2367_v2, 0.0 }
 0x2da   : > { %v2733_v45 = vpop.f32.mrb[6].mxu1  ;;  %2433 = vst.msk [vmem:[%s4149_s26 + $0x38] sm:$0xff] %vm2425_vm11, %v2400_v50 }
 0x2db   : > { %v2345_v17 = vmul.f32 %v2733_v45, %v4129_v54  ;;  %v2266_v19 = vpop.f32.mrb[7].mxu1  ;;  %2432 = vst.msk [vmem:[%s4149_s26 + $0x30] sm:$0xff] %vm2425_vm11, %v2399_v12 }
 0x2dc   : > { %v2344_v32 = vmul.f32 %v4129_v54, %v2266_v19 }
 0x2dd   : > { %v2384_v21 = vadd.f32 %v4134_v47, %v2345_v17 }
 0x2de   : > { %v2383_v29 = vadd.f32 %v4134_v47, %v2344_v32 }
 0x2df   : > { %v2416_v39 = vmax.f32 %v2384_v21, 0.0 }
 0x2e0   : > { %v2415_v22 = vmax.f32 %v2383_v29, 0.0 }
 0x2e1   : > { %2449 = vst.msk [vmem:[%s4149_s26 + $0xb8] sm:$0xff] %vm2425_vm11, %v2416_v39 }
 0x2e2   : > { %2448 = vst.msk [vmem:[%s4149_s26 + $0xb0] sm:$0xff] %vm2425_vm11, %v2415_v22 }
 0x2fb   : > { %v2712_v35 = vpop.f32.mrb[8].mxu0 }
 0x2fc   : > { %v2331_v38 = vmul.f32 %v2712_v35, %v4129_v54  ;;  %v2196_v27 = vpop.f32.mrb[9].mxu0 }
 0x2fd   : > { %v2330_v11 = vmul.f32 %v4129_v54, %v2196_v27 }
 0x2fe   : > { %v2370_v0 = vadd.f32 %v4134_v47, %v2331_v38 }
 0x2ff   : > { %v2369_v31 = vadd.f32 %v4134_v47, %v2330_v11 }
 0x300   : > { %v2402_v24 = vmax.f32 %v2370_v0, 0.0 }
 0x301   : > { %v2401_v14 = vmax.f32 %v2369_v31, 0.0 }
 0x302   : > { %v2736_v56 = vpop.f32.mrb[8].mxu1  ;;  %2435 = vst.msk [vmem:[%s4149_s26 + $0x48] sm:$0xff] %vm2425_vm11, %v2402_v24 }
 0x303   : > { %v2347_v28 = vmul.f32 %v2736_v56, %v4129_v54  ;;  %v2276_v40 = vpop.f32.mrb[9].mxu1  ;;  %2434 = vst.msk [vmem:[%s4149_s26 + $0x40] sm:$0xff] %vm2425_vm11, %v2401_v14 }
 0x304   : > { %v2346_v16 = vmul.f32 %v4129_v54, %v2276_v40 }
 0x305   : > { %v2386_v20 = vadd.f32 %v4134_v47, %v2347_v28 }
 0x306   : > { %v2385_v52 = vadd.f32 %v4134_v47, %v2346_v16 }
 0x307   : > { %v2418_v30 = vmax.f32 %v2386_v20, 0.0 }
 0x308   : > { %v2417_v62 = vmax.f32 %v2385_v52, 0.0 }
 0x309   : > { %2451 = vst.msk [vmem:[%s4149_s26 + $0xc8] sm:$0xff] %vm2425_vm11, %v2418_v30 }
 0x30a   : > { %2450 = vst.msk [vmem:[%s4149_s26 + $0xc0] sm:$0xff] %vm2425_vm11, %v2417_v62 }
 0x323   : > { %v2715_v63 = vpop.f32.mrb[10].mxu0 }
 0x324   : > { %v2333_v46 = vmul.f32 %v2715_v63, %v4129_v54  ;;  %v2206_v61 = vpop.f32.mrb[11].mxu0 }
 0x325   : > { %v2332_v51 = vmul.f32 %v4129_v54, %v2206_v61 }
 0x326   : > { %v2372_v49 = vadd.f32 %v4134_v47, %v2333_v46 }
 0x327   : > { %v2371_v13 = vadd.f32 %v4134_v47, %v2332_v51 }
 0x328   : > { %v2404_v5 = vmax.f32 %v2372_v49, 0.0 }
 0x329   : > { %v2403_v4 = vmax.f32 %v2371_v13, 0.0 }
 0x32a   : > { %v2739_v10 = vpop.f32.mrb[10].mxu1  ;;  %2437 = vst.msk [vmem:[%s4149_s26 + $0x58] sm:$0xff] %vm2425_vm11, %v2404_v5 }
 0x32b   : > { %v2349_v9 = vmul.f32 %v2739_v10, %v4129_v54  ;;  %v2286_v57 = vpop.f32.mrb[11].mxu1  ;;  %2436 = vst.msk [vmem:[%s4149_s26 + $0x50] sm:$0xff] %vm2425_vm11, %v2403_v4 }
 0x32c   : > { %v2348_v41 = vmul.f32 %v4129_v54, %v2286_v57 }
 0x32d   : > { %v2388_v6 = vadd.f32 %v4134_v47, %v2349_v9 }
 0x32e   : > { %v2387_v33 = vadd.f32 %v4134_v47, %v2348_v41 }
 0x32f   : > { %v2420_v42 = vmax.f32 %v2388_v6, 0.0 }
 0x330   : > { %v2419_v1 = vmax.f32 %v2387_v33, 0.0 }
 0x331   : > { %2453 = vst.msk [vmem:[%s4149_s26 + $0xd8] sm:$0xff] %vm2425_vm11, %v2420_v42 }
 0x332   : > { %2452 = vst.msk [vmem:[%s4149_s26 + $0xd0] sm:$0xff] %vm2425_vm11, %v2419_v1 }
 0x34b   : > { %v2718_v34 = vpop.f32.mrb[12].mxu0 }
 0x34c   : > { %v2335_v36 = vmul.f32 %v2718_v34, %v4129_v54  ;;  %v2216_v18 = vpop.f32.mrb[13].mxu0 }
 0x34d   : > { %v2334_v59 = vmul.f32 %v4129_v54, %v2216_v18 }
 0x34e   : > { %v2374_v7 = vadd.f32 %v4134_v47, %v2335_v36 }
 0x34f   : > { %v2373_v15 = vadd.f32 %v4134_v47, %v2334_v59 }
 0x350   : > { %v2406_v48 = vmax.f32 %v2374_v7, 0.0 }
 0x351   : > { %v2405_v26 = vmax.f32 %v2373_v15, 0.0 }
 0x352   : > { %v2742_v53 = vpop.f32.mrb[12].mxu1  ;;  %2439 = vst.msk [vmem:[%s4149_s26 + $0x68] sm:$0xff] %vm2425_vm11, %v2406_v48 }
 0x353   : > { %v2351_v25 = vmul.f32 %v2742_v53, %v4129_v54  ;;  %v2296_v37 = vpop.f32.mrb[13].mxu1  ;;  %2438 = vst.msk [vmem:[%s4149_s26 + $0x60] sm:$0xff] %vm2425_vm11, %v2405_v26 }
 0x354   : > { %v2350_v44 = vmul.f32 %v4129_v54, %v2296_v37 }
 0x355   : > { %v2390_v3 = vadd.f32 %v4134_v47, %v2351_v25 }
 0x356   : > { %v2389_v60 = vadd.f32 %v4134_v47, %v2350_v44 }
 0x357   : > { %v2422_v8 = vmax.f32 %v2390_v3, 0.0 }
 0x358   : > { %v2421_v23 = vmax.f32 %v2389_v60, 0.0 }
 0x359   : > { %2455 = vst.msk [vmem:[%s4149_s26 + $0xe8] sm:$0xff] %vm2425_vm11, %v2422_v8 }
 0x35a   : > { %2454 = vst.msk [vmem:[%s4149_s26 + $0xe0] sm:$0xff] %vm2425_vm11, %v2421_v23 }
 0x367   : > { %v2721_v55 = vpop.f32.mrb[14].mxu0 }
 0x368   : > { %v2337_v43 = vmul.f32 %v2721_v55, %v4129_v54  ;;  %v2226_v58 = vpop.f32.mrb[15].mxu0 }
 0x369   : > { %v2336_v2 = vmul.f32 %v4129_v54, %v2226_v58 }
 0x36a   : > { %v2376_v50 = vadd.f32 %v4134_v47, %v2337_v43 }
 0x36b   : > { %v2375_v12 = vadd.f32 %v4134_v47, %v2336_v2 }
 0x36c   : > { %v2408_v45 = vmax.f32 %v2376_v50, 0.0 }
 0x36d   : > { %v2407_v17 = vmax.f32 %v2375_v12, 0.0 }
 0x36e   : > { %v2745_v19 = vpop.f32.mrb[14].mxu1  ;;  %2441 = vst.msk [vmem:[%s4149_s26 + $0x78] sm:$0xff] %vm2425_vm11, %v2408_v45 }
 0x36f   : > { %v2353_v32 = vmul.f32 %v2745_v19, %v4129_v54  ;;  %v2306_v21 = vpop.f32.mrb[15].mxu1  ;;  %2440 = vst.msk [vmem:[%s4149_s26 + $0x70] sm:$0xff] %vm2425_vm11, %v2407_v17 }
 0x370   : > { %v2352_v29 = vmul.f32 %v4129_v54, %v2306_v21 }
 0x371   : > { %v2392_v39 = vadd.f32 %v4134_v47, %v2353_v32 }
 0x372   : > { %v2391_v22 = vadd.f32 %v4134_v47, %v2352_v29 }
 0x373   : > { %v2424_v35 = vmax.f32 %v2392_v39, 0.0 }
 0x374   : > { %v2423_v38 = vmax.f32 %v2391_v22, 0.0 }
 0x375   : > { %2457 = vst.msk [vmem:[%s4149_s26 + $0xf8] sm:$0xff] %vm2425_vm11, %v2424_v35 }
 0x376   : > { %2456 = vst.msk [vmem:[%s4149_s26 + $0xf0] sm:$0xff] %vm2425_vm11, %v2423_v38 }
 0x377 PF: > { %s14_s17 = sadd.s32 1, %s2834_s17   ;;  %s4555_s15 = smov %s2830_s16 }
 0x378   : > { %p11_p5 = scmp.ge.s32.totalorder %s14_s17, 4   ;;  %s4556_s16 = smov %s4558_s18 }
 0x37a   :  { %13 = sbr.rel (!%p11_p5) target bundleno = 2 (0x2), region = 78 }

</bundles_post_ra>
